<compile_context>
chip_gen: v6e
topology: v6e:2x2x1
jax: 0.10.0
libtpu: 0.0.40
codegen_flags: <defaults>
</compile_context>

<pallas_src>
import functools

import jax
import jax.numpy as jnp
from jax import lax
from jax.experimental import pallas as pl
from jax.experimental.pallas import tpu as pltpu

IN_FEATS = 23 * 5          # 115
NUM_LAYERS = 3
LANE = 128
SUBLANE = 8


def _round_up(n, m):
    return ((n + m - 1) // m) * m


def _network_kernel(x_ref, mask_ref, waff_ref, baff_ref, wih_ref, whh_ref,
                    bgate_ref, wcls_ref, bcls_ref, out_ref,
                    buf_ref, gin_ref, *, T, Bb, Hp):
    # ---- affine (115 -> H) + tanh: one lane-aligned MXU matmul -------------
    x = x_ref[...].reshape(T * Bb, x_ref.shape[-1])                 # bf16
    h0 = jnp.tanh(
        jnp.dot(x, waff_ref[...], preferred_element_type=jnp.float32)
        + baff_ref[...])                                            # f32
    buf_ref[...] = h0.reshape(T, Bb, Hp).astype(buf_ref.dtype)

    # ---- 3-layer unidirectional LSTM ----------------------------------------
    for layer in range(NUM_LAYERS):
        w_hh = whh_ref[layer]                                       # (Hp, 4Hp) bf16

        # Hoisted input projection (+ fused bias): one big matmul per layer
        # instead of T tiny (Bb,Hp)x(Hp,4Hp) matmuls on the recurrent path.
        xin = buf_ref[...].reshape(T * Bb, Hp)                      # bf16
        gin = (jnp.dot(xin, wih_ref[layer],
                       preferred_element_type=jnp.float32)
               + bgate_ref[layer])                                  # f32 (T*Bb, 4Hp)
        gin_ref[...] = gin.reshape(T, Bb, 4 * Hp)

        def step(t, carry, w_hh=w_hh):
            h_t, c_t = carry                                        # f32 (Bb, Hp)
            gates = gin_ref[t] + jnp.dot(
                h_t.astype(w_hh.dtype), w_hh,
                preferred_element_type=jnp.float32)                 # f32 (Bb, 4Hp)
            # Hp % 128 == 0  ->  each gate slice is a whole lane-tile view.
            i = jax.nn.sigmoid(gates[:, 0 * Hp:1 * Hp])
            f = jax.nn.sigmoid(gates[:, 1 * Hp:2 * Hp])
            g = jnp.tanh(gates[:, 2 * Hp:3 * Hp])
            o = jax.nn.sigmoid(gates[:, 3 * Hp:4 * Hp])
            c_t = f * c_t + i * g
            h_t = o * jnp.tanh(c_t)
            buf_ref[t] = h_t.astype(buf_ref.dtype)
            return (h_t, c_t)

        zeros = jnp.zeros((Bb, Hp), jnp.float32)
        lax.fori_loop(0, T, step, (zeros, zeros))

    # ---- pad_packed masking + classification head (vectorized) -------------
    h_all = buf_ref[...].astype(jnp.float32) * mask_ref[...]        # (T, Bb, Hp)
    logits = (jnp.dot(h_all.reshape(T * Bb, Hp).astype(wcls_ref.dtype),
                      wcls_ref[...], preferred_element_type=jnp.float32)
              + bcls_ref[...])                                      # (T*Bb, Op)
    out_ref[...] = logits.reshape(T, Bb, out_ref.shape[-1])         # lane-dense store


def network_forward(params, x, lx, *, batch_blocks=1):
    """x: (B, T, 115) f32, lx: (B,) int -> logits (B, T, O).

    Positions t >= lx[b] hold b_cls (identical to PyTorch: Linear applied to
    the zero-padded pad_packed output).  Full T is returned so this function
    stays jittable; trim to max(lx) in the caller.  Use batch_blocks=2 on v7x
    to split the independent batch recurrences across the two TensorCores.
    """
    B, T, F = x.shape
    assert F == IN_FEATS
    H = params["w_aff"].shape[1]
    O = params["w_cls"].shape[1]
    Fp = _round_up(IN_FEATS, LANE)
    Hp = _round_up(H, LANE)
    Op = _round_up(O, LANE)
    Bp = _round_up(B, SUBLANE)        # batch padded to a full sublane tile

    # ---- grid over batch blocks (each block must stay (8,*)-aligned) -------
    nblk = batch_blocks
    if nblk < 1 or Bp % nblk != 0 or (Bp // nblk) % SUBLANE != 0:
        nblk = 1
    Bb = Bp // nblk

    # ---- repack weights: zero-pad to lane multiples, bf16 matmul inputs ----
    def pack_gates(w):  # (..., 4H) -> (..., 4Hp), gate k at [k*Hp, k*Hp+H)
        pads = [(0, 0)] * (w.ndim - 1) + [(0, Hp - H)]
        return jnp.concatenate(
            [jnp.pad(w[..., k * H:(k + 1) * H], pads) for k in range(4)],
            axis=-1)

    w_aff = jnp.pad(params["w_aff"],
                    ((0, Fp - IN_FEATS), (0, Hp - H))).astype(jnp.bfloat16)
    b_aff = jnp.pad(params["b_aff"], ((0, 0), (0, Hp - H)))                  # f32
    w_ih = pack_gates(jnp.pad(params["w_ih"],
                              ((0, 0), (0, Hp - H), (0, 0)))).astype(jnp.bfloat16)
    w_hh = pack_gates(jnp.pad(params["w_hh"],
                              ((0, 0), (0, Hp - H), (0, 0)))).astype(jnp.bfloat16)
    b_g = pack_gates(params["b_gates"])                                      # f32
    w_cls = jnp.pad(params["w_cls"],
                    ((0, Hp - H), (0, Op - O))).astype(jnp.bfloat16)
    b_cls = jnp.pad(params["b_cls"], ((0, 0), (0, Op - O)))                  # f32

    # ---- inputs: time-major, tile-padded, bf16; length mask precomputed ----
    x_tbf = jnp.pad(jnp.transpose(x, (1, 0, 2)).astype(jnp.float32),
                    ((0, 0), (0, Bp - B), (0, Fp - IN_FEATS))).astype(jnp.bfloat16)
    lx_p = jnp.pad(lx.astype(jnp.int32), (0, Bp - B))        # pad rows -> length 0
    t_idx = jnp.arange(T, dtype=jnp.int32)[:, None, None]
    mask = (t_idx < lx_p[None, :, None]).astype(jnp.float32)  # (T, Bp, 1)

    kernel = functools.partial(_network_kernel, T=T, Bb=Bb, Hp=Hp)

    out_tbo = pl.pallas_call(
        kernel,
        out_shape=jax.ShapeDtypeStruct((T, Bp, Op), jnp.float32),
        grid=(nblk,),
        in_specs=[
            pl.BlockSpec((T, Bb, Fp), lambda i: (0, i, 0)),               # x
            pl.BlockSpec((T, Bb, 1), lambda i: (0, i, 0)),                # mask
            pl.BlockSpec((Fp, Hp), lambda i: (0, 0)),                     # w_aff
            pl.BlockSpec((1, Hp), lambda i: (0, 0)),                      # b_aff
            pl.BlockSpec((NUM_LAYERS, Hp, 4 * Hp), lambda i: (0, 0, 0)),  # w_ih
            pl.BlockSpec((NUM_LAYERS, Hp, 4 * Hp), lambda i: (0, 0, 0)),  # w_hh
            pl.BlockSpec((NUM_LAYERS, 1, 4 * Hp), lambda i: (0, 0, 0)),   # b_gates
            pl.BlockSpec((Hp, Op), lambda i: (0, 0)),                     # w_cls
            pl.BlockSpec((1, Op), lambda i: (0, 0)),                      # b_cls
        ],
        out_specs=pl.BlockSpec((T, Bb, Op), lambda i: (0, i, 0)),
        scratch_shapes=[
            pltpu.VMEM((T, Bb, Hp), jnp.bfloat16),      # layer input/output buffer
            pltpu.VMEM((T, Bb, 4 * Hp), jnp.float32),   # hoisted input-gate projections
        ],
        compiler_params=pltpu.CompilerParams(
            dimension_semantics=("parallel",),
            vmem_limit_bytes=48 * 1024 * 1024),
    )(x_tbf, mask, w_aff, b_aff, w_ih, w_hh, b_g, w_cls, b_cls)

    return jnp.transpose(out_tbo[:, :B, :O], (1, 0, 2))               # (B, T, O)


def init_params(key, hidden_size, output_size):
    ks = jax.random.split(key, 8)
    s = 0.1
    H, O = hidden_size, output_size
    return {
        # Linear(115, H): stored pre-transposed as (115, H)
        "w_aff": s * jax.random.normal(ks[0], (IN_FEATS, H), jnp.float32),
        "b_aff": s * jax.random.normal(ks[1], (1, H), jnp.float32),
        # LSTM: weight_ih/weight_hh pre-transposed to (in, 4H), gate order
        # [i, f, g, o]; biases summed (b_ih + b_hh).
        "w_ih": s * jax.random.normal(ks[2], (NUM_LAYERS, H, 4 * H), jnp.float32),
        "w_hh": s * jax.random.normal(ks[3], (NUM_LAYERS, H, 4 * H), jnp.float32),
        "b_gates": s * jax.random.normal(ks[4], (NUM_LAYERS, 1, 4 * H), jnp.float32),
        # Linear(H, O): stored pre-transposed as (H, O)
        "w_cls": s * jax.random.normal(ks[5], (H, O), jnp.float32),
        "b_cls": s * jax.random.normal(ks[6], (1, O), jnp.float32),
    }


if __name__ == "__main__":
    key = jax.random.PRNGKey(0)
    B, T, H, O = 2, 8, 32, 16

    kx, kp = jax.random.split(key)
    x = jax.random.normal(kx, (B, T, IN_FEATS), jnp.float32)
    lx = jnp.array([8, 5], dtype=jnp.int32)      # variable lengths, max == T
    params = init_params(kp, H, O)

    fwd = jax.jit(network_forward)               # jittable: no host sync inside
    logits_full = fwd(params, x, lx)             # (B, T, O)
    jax.block_until_ready(logits_full)

    t_out = int(lx.max())                        # pad_packed trims to max(lx)
    logits = logits_full[:, :t_out, :]
    assert logits.shape == (B, t_out, O)
    assert bool(jnp.isfinite(logits).all())
    print("KERNEL_OK")
</pallas_src>

<mosaic_0001>
module attributes {stable_mosaic.version = 11 : i64} {
  func.func @_network_kernel(%arg0: i32, %arg1: memref<8x8x128xbf16, #tpu.memory_space<vmem>>, %arg2: memref<8x8x1xf32, #tpu.memory_space<vmem>>, %arg3: memref<128x128xbf16, #tpu.memory_space<vmem>>, %arg4: memref<1x128xf32, #tpu.memory_space<vmem>>, %arg5: memref<3x128x512xbf16, #tpu.memory_space<vmem>>, %arg6: memref<3x128x512xbf16, #tpu.memory_space<vmem>>, %arg7: memref<3x1x512xf32, #tpu.memory_space<vmem>>, %arg8: memref<128x128xbf16, #tpu.memory_space<vmem>>, %arg9: memref<1x128xf32, #tpu.memory_space<vmem>>, %arg10: memref<8x8x128xf32, #tpu.memory_space<vmem>>, %arg11: memref<8x8x128xbf16, #tpu.memory_space<vmem>>, %arg12: memref<8x8x512xf32, #tpu.memory_space<vmem>>) attributes {dimension_semantics = [#tpu.dimension_semantics<parallel>], iteration_bounds = array<i64: 1>, scalar_prefetch = 0 : i64, scratch_operands = 2 : i64, tpu.core_type = #tpu.core_type<tc>, window_params = [{transform_indices = @transform_0, window_bounds = array<i64: 8, 8, 128>}, {transform_indices = @transform_1, window_bounds = array<i64: 8, 8, 1>}, {pipeline_mode = #tpu.pipeline_mode<synchronous>, transform_indices = @transform_2, window_bounds = array<i64: 128, 128>}, {pipeline_mode = #tpu.pipeline_mode<synchronous>, transform_indices = @transform_3, window_bounds = array<i64: 1, 128>}, {pipeline_mode = #tpu.pipeline_mode<synchronous>, transform_indices = @transform_4, window_bounds = array<i64: 3, 128, 512>}, {pipeline_mode = #tpu.pipeline_mode<synchronous>, transform_indices = @transform_5, window_bounds = array<i64: 3, 128, 512>}, {pipeline_mode = #tpu.pipeline_mode<synchronous>, transform_indices = @transform_6, window_bounds = array<i64: 3, 1, 512>}, {pipeline_mode = #tpu.pipeline_mode<synchronous>, transform_indices = @transform_7, window_bounds = array<i64: 128, 128>}, {pipeline_mode = #tpu.pipeline_mode<synchronous>, transform_indices = @transform_8, window_bounds = array<i64: 1, 128>}, {transform_indices = @transform_9, window_bounds = array<i64: 8, 8, 128>}]} {
    %c0 = arith.constant 0 : index
    %c0_0 = arith.constant 0 : index
    %c0_1 = arith.constant 0 : index
    %0 = vector.load %arg1[%c0, %c0_0, %c0_1] : memref<8x8x128xbf16, #tpu.memory_space<vmem>>, vector<8x8x128xbf16>
    %1 = vector.shape_cast %0 : vector<8x8x128xbf16> to vector<64x128xbf16>
    %c0_2 = arith.constant 0 : index
    %c0_3 = arith.constant 0 : index
    %2 = vector.load %arg3[%c0_2, %c0_3] : memref<128x128xbf16, #tpu.memory_space<vmem>>, vector<128x128xbf16>
    %cst = arith.constant dense<0.000000e+00> : vector<64x128xf32>
    %3 = tpu.matmul %1, %2, %cst {dimension_numbers = #tpu.dot_dimension_numbers<[1], [0], [0], [1], [0, 0, 1, 1], [], []>} : vector<64x128xbf16>, vector<128x128xbf16>, vector<64x128xf32> -> vector<64x128xf32>
    %c0_4 = arith.constant 0 : index
    %c0_5 = arith.constant 0 : index
    %4 = vector.load %arg4[%c0_4, %c0_5] : memref<1x128xf32, #tpu.memory_space<vmem>>, vector<1x128xf32>
    %5 = vector.broadcast %4 : vector<1x128xf32> to vector<64x128xf32>
    %6 = arith.addf %3, %5 : vector<64x128xf32>
    %7 = math.tanh %6 : vector<64x128xf32>
    %8 = vector.shape_cast %7 : vector<64x128xf32> to vector<8x8x128xf32>
    %9 = arith.truncf %8 : vector<8x8x128xf32> to vector<8x8x128xbf16>
    %c0_6 = arith.constant 0 : index
    %c0_7 = arith.constant 0 : index
    %c0_8 = arith.constant 0 : index
    %10 = vector.load %arg11[%c0_6, %c0_7, %c0_8] : memref<8x8x128xbf16, #tpu.memory_space<vmem>>, vector<8x8x128xbf16>
    tpu.vector_store %arg11[%c0_6, %c0_7, %c0_8], %9 {strides = array<i32>} : memref<8x8x128xbf16, #tpu.memory_space<vmem>>, vector<8x8x128xbf16>,
    %c0_9 = arith.constant 0 : index
    %c0_10 = arith.constant 0 : index
    %c0_11 = arith.constant 0 : index
    %11 = vector.load %arg6[%c0_9, %c0_10, %c0_11] : memref<3x128x512xbf16, #tpu.memory_space<vmem>>, vector<1x128x512xbf16>
    %12 = vector.shape_cast %11 : vector<1x128x512xbf16> to vector<128x512xbf16>
    %c0_12 = arith.constant 0 : index
    %c0_13 = arith.constant 0 : index
    %c0_14 = arith.constant 0 : index
    %13 = vector.load %arg11[%c0_12, %c0_13, %c0_14] : memref<8x8x128xbf16, #tpu.memory_space<vmem>>, vector<8x8x128xbf16>
    %14 = vector.shape_cast %13 : vector<8x8x128xbf16> to vector<64x128xbf16>
    %c0_15 = arith.constant 0 : index
    %c0_16 = arith.constant 0 : index
    %c0_17 = arith.constant 0 : index
    %15 = vector.load %arg5[%c0_15, %c0_16, %c0_17] : memref<3x128x512xbf16, #tpu.memory_space<vmem>>, vector<1x128x512xbf16>
    %16 = vector.shape_cast %15 : vector<1x128x512xbf16> to vector<128x512xbf16>
    %cst_18 = arith.constant dense<0.000000e+00> : vector<64x512xf32>
    %17 = tpu.matmul %14, %16, %cst_18 {dimension_numbers = #tpu.dot_dimension_numbers<[1], [0], [0], [1], [0, 0, 1, 1], [], []>} : vector<64x128xbf16>, vector<128x512xbf16>, vector<64x512xf32> -> vector<64x512xf32>
    %c0_19 = arith.constant 0 : index
    %c0_20 = arith.constant 0 : index
    %c0_21 = arith.constant 0 : index
    %18 = vector.load %arg7[%c0_19, %c0_20, %c0_21] : memref<3x1x512xf32, #tpu.memory_space<vmem>>, vector<1x1x512xf32>
    %19 = vector.shape_cast %18 : vector<1x1x512xf32> to vector<1x512xf32>
    %20 = vector.broadcast %19 : vector<1x512xf32> to vector<64x512xf32>
    %21 = arith.addf %17, %20 : vector<64x512xf32>
    %22 = vector.shape_cast %21 : vector<64x512xf32> to vector<8x8x512xf32>
    %c0_22 = arith.constant 0 : index
    %c0_23 = arith.constant 0 : index
    %c0_24 = arith.constant 0 : index
    %23 = vector.load %arg12[%c0_22, %c0_23, %c0_24] : memref<8x8x512xf32, #tpu.memory_space<vmem>>, vector<8x8x512xf32>
    tpu.vector_store %arg12[%c0_22, %c0_23, %c0_24], %22 {strides = array<i32>} : memref<8x8x512xf32, #tpu.memory_space<vmem>>, vector<8x8x512xf32>,
    %cst_25 = arith.constant 0.000000e+00 : f32
    %24 = vector.broadcast %cst_25 : f32 to vector<8x128xf32>
    %c0_i32 = arith.constant 0 : i32
    %c8_i32 = arith.constant 8 : i32
    %25 = arith.addi %c0_i32, %c8_i32 : i32
    %c1_i32 = arith.constant 1 : i32
    %26:2 = scf.for %arg13 = %c0_i32 to %25 step %c1_i32 iter_args(%arg14 = %24, %arg15 = %24) -> (vector<8x128xf32>, vector<8x128xf32>)  : i32 {
      %73 = arith.index_cast %arg13 : i32 to index
      %c0_81 = arith.constant 0 : index
      %c0_82 = arith.constant 0 : index
      %74 = vector.load %arg12[%73, %c0_81, %c0_82] : memref<8x8x512xf32, #tpu.memory_space<vmem>>, vector<1x8x512xf32>
      %75 = vector.shape_cast %74 : vector<1x8x512xf32> to vector<8x512xf32>
      %76 = arith.truncf %arg14 : vector<8x128xf32> to vector<8x128xbf16>
      %cst_83 = arith.constant dense<0.000000e+00> : vector<8x512xf32>
      %77 = tpu.matmul %76, %12, %cst_83 {dimension_numbers = #tpu.dot_dimension_numbers<[1], [0], [0], [1], [0, 0, 1, 1], [], []>} : vector<8x128xbf16>, vector<128x512xbf16>, vector<8x512xf32> -> vector<8x512xf32>
      %78 = arith.addf %75, %77 : vector<8x512xf32>
      %79 = vector.extract_strided_slice %78 {offsets = [0, 0], sizes = [8, 128], strides = [1, 1]} : vector<8x512xf32> to vector<8x128xf32>
      %80 = arith.negf %79 : vector<8x128xf32>
      %81 = math.exp %80 : vector<8x128xf32>
      %cst_84 = arith.constant 1.000000e+00 : f32
      %82 = vector.broadcast %cst_84 : f32 to vector<8x128xf32>
      %83 = arith.addf %82, %81 : vector<8x128xf32>
      %84 = arith.divf %82, %83 : vector<8x128xf32>
      %85 = vector.extract_strided_slice %78 {offsets = [0, 128], sizes = [8, 128], strides = [1, 1]} : vector<8x512xf32> to vector<8x128xf32>
      %86 = arith.negf %85 : vector<8x128xf32>
      %87 = math.exp %86 : vector<8x128xf32>
      %cst_85 = arith.constant 1.000000e+00 : f32
      %88 = vector.broadcast %cst_85 : f32 to vector<8x128xf32>
      %89 = arith.addf %88, %87 : vector<8x128xf32>
      %90 = arith.divf %88, %89 : vector<8x128xf32>
      %91 = vector.extract_strided_slice %78 {offsets = [0, 256], sizes = [8, 128], strides = [1, 1]} : vector<8x512xf32> to vector<8x128xf32>
      %92 = math.tanh %91 : vector<8x128xf32>
      %93 = vector.extract_strided_slice %78 {offsets = [0, 384], sizes = [8, 128], strides = [1, 1]} : vector<8x512xf32> to vector<8x128xf32>
      %94 = arith.negf %93 : vector<8x128xf32>
      %95 = math.exp %94 : vector<8x128xf32>
      %cst_86 = arith.constant 1.000000e+00 : f32
      %96 = vector.broadcast %cst_86 : f32 to vector<8x128xf32>
      %97 = arith.addf %96, %95 : vector<8x128xf32>
      %98 = arith.divf %96, %97 : vector<8x128xf32>
      %99 = arith.mulf %90, %arg15 : vector<8x128xf32>
      %100 = arith.mulf %84, %92 : vector<8x128xf32>
      %101 = arith.addf %99, %100 : vector<8x128xf32>
      %102 = math.tanh %101 : vector<8x128xf32>
      %103 = arith.mulf %98, %102 : vector<8x128xf32>
      %104 = arith.truncf %103 : vector<8x128xf32> to vector<8x128xbf16>
      %105 = arith.index_cast %arg13 : i32 to index
      %c0_87 = arith.constant 0 : index
      %c0_88 = arith.constant 0 : index
      %106 = vector.load %arg11[%105, %c0_87, %c0_88] : memref<8x8x128xbf16, #tpu.memory_space<vmem>>, vector<1x8x128xbf16>
      %107 = vector.shape_cast %106 : vector<1x8x128xbf16> to vector<8x128xbf16>
      %108 = vector.shape_cast %104 : vector<8x128xbf16> to vector<1x8x128xbf16>
      tpu.vector_store %arg11[%105, %c0_87, %c0_88], %108 {strides = array<i32>} : memref<8x8x128xbf16, #tpu.memory_space<vmem>>, vector<1x8x128xbf16>,
      scf.yield %103, %101 : vector<8x128xf32>, vector<8x128xf32>
    }
    %c8_i32_26 = arith.constant 8 : i32
    %c1 = arith.constant 1 : index
    %c0_27 = arith.constant 0 : index
    %c0_28 = arith.constant 0 : index
    %27 = vector.load %arg6[%c1, %c0_27, %c0_28] : memref<3x128x512xbf16, #tpu.memory_space<vmem>>, vector<1x128x512xbf16>
    %28 = vector.shape_cast %27 : vector<1x128x512xbf16> to vector<128x512xbf16>
    %c0_29 = arith.constant 0 : index
    %c0_30 = arith.constant 0 : index
    %c0_31 = arith.constant 0 : index
    %29 = vector.load %arg11[%c0_29, %c0_30, %c0_31] : memref<8x8x128xbf16, #tpu.memory_space<vmem>>, vector<8x8x128xbf16>
    %30 = vector.shape_cast %29 : vector<8x8x128xbf16> to vector<64x128xbf16>
    %c1_32 = arith.constant 1 : index
    %c0_33 = arith.constant 0 : index
    %c0_34 = arith.constant 0 : index
    %31 = vector.load %arg5[%c1_32, %c0_33, %c0_34] : memref<3x128x512xbf16, #tpu.memory_space<vmem>>, vector<1x128x512xbf16>
    %32 = vector.shape_cast %31 : vector<1x128x512xbf16> to vector<128x512xbf16>
    %cst_35 = arith.constant dense<0.000000e+00> : vector<64x512xf32>
    %33 = tpu.matmul %30, %32, %cst_35 {dimension_numbers = #tpu.dot_dimension_numbers<[1], [0], [0], [1], [0, 0, 1, 1], [], []>} : vector<64x128xbf16>, vector<128x512xbf16>, vector<64x512xf32> -> vector<64x512xf32>
    %c1_36 = arith.constant 1 : index
    %c0_37 = arith.constant 0 : index
    %c0_38 = arith.constant 0 : index
    %34 = vector.load %arg7[%c1_36, %c0_37, %c0_38] : memref<3x1x512xf32, #tpu.memory_space<vmem>>, vector<1x1x512xf32>
    %35 = vector.shape_cast %34 : vector<1x1x512xf32> to vector<1x512xf32>
    %36 = vector.broadcast %35 : vector<1x512xf32> to vector<64x512xf32>
    %37 = arith.addf %33, %36 : vector<64x512xf32>
    %38 = vector.shape_cast %37 : vector<64x512xf32> to vector<8x8x512xf32>
    %c0_39 = arith.constant 0 : index
    %c0_40 = arith.constant 0 : index
    %c0_41 = arith.constant 0 : index
    %39 = vector.load %arg12[%c0_39, %c0_40, %c0_41] : memref<8x8x512xf32, #tpu.memory_space<vmem>>, vector<8x8x512xf32>
    tpu.vector_store %arg12[%c0_39, %c0_40, %c0_41], %38 {strides = array<i32>} : memref<8x8x512xf32, #tpu.memory_space<vmem>>, vector<8x8x512xf32>,
    %cst_42 = arith.constant 0.000000e+00 : f32
    %40 = vector.broadcast %cst_42 : f32 to vector<8x128xf32>
    %c0_i32_43 = arith.constant 0 : i32
    %c8_i32_44 = arith.constant 8 : i32
    %41 = arith.addi %c0_i32_43, %c8_i32_44 : i32
    %c1_i32_45 = arith.constant 1 : i32
    %42:2 = scf.for %arg13 = %c0_i32_43 to %41 step %c1_i32_45 iter_args(%arg14 = %40, %arg15 = %40) -> (vector<8x128xf32>, vector<8x128xf32>)  : i32 {
      %73 = arith.index_cast %arg13 : i32 to index
      %c0_81 = arith.constant 0 : index
      %c0_82 = arith.constant 0 : index
      %74 = vector.load %arg12[%73, %c0_81, %c0_82] : memref<8x8x512xf32, #tpu.memory_space<vmem>>, vector<1x8x512xf32>
      %75 = vector.shape_cast %74 : vector<1x8x512xf32> to vector<8x512xf32>
      %76 = arith.truncf %arg14 : vector<8x128xf32> to vector<8x128xbf16>
      %cst_83 = arith.constant dense<0.000000e+00> : vector<8x512xf32>
      %77 = tpu.matmul %76, %28, %cst_83 {dimension_numbers = #tpu.dot_dimension_numbers<[1], [0], [0], [1], [0, 0, 1, 1], [], []>} : vector<8x128xbf16>, vector<128x512xbf16>, vector<8x512xf32> -> vector<8x512xf32>
      %78 = arith.addf %75, %77 : vector<8x512xf32>
      %79 = vector.extract_strided_slice %78 {offsets = [0, 0], sizes = [8, 128], strides = [1, 1]} : vector<8x512xf32> to vector<8x128xf32>
      %80 = arith.negf %79 : vector<8x128xf32>
      %81 = math.exp %80 : vector<8x128xf32>
      %cst_84 = arith.constant 1.000000e+00 : f32
      %82 = vector.broadcast %cst_84 : f32 to vector<8x128xf32>
      %83 = arith.addf %82, %81 : vector<8x128xf32>
      %84 = arith.divf %82, %83 : vector<8x128xf32>
      %85 = vector.extract_strided_slice %78 {offsets = [0, 128], sizes = [8, 128], strides = [1, 1]} : vector<8x512xf32> to vector<8x128xf32>
      %86 = arith.negf %85 : vector<8x128xf32>
      %87 = math.exp %86 : vector<8x128xf32>
      %cst_85 = arith.constant 1.000000e+00 : f32
      %88 = vector.broadcast %cst_85 : f32 to vector<8x128xf32>
      %89 = arith.addf %88, %87 : vector<8x128xf32>
      %90 = arith.divf %88, %89 : vector<8x128xf32>
      %91 = vector.extract_strided_slice %78 {offsets = [0, 256], sizes = [8, 128], strides = [1, 1]} : vector<8x512xf32> to vector<8x128xf32>
      %92 = math.tanh %91 : vector<8x128xf32>
      %93 = vector.extract_strided_slice %78 {offsets = [0, 384], sizes = [8, 128], strides = [1, 1]} : vector<8x512xf32> to vector<8x128xf32>
      %94 = arith.negf %93 : vector<8x128xf32>
      %95 = math.exp %94 : vector<8x128xf32>
      %cst_86 = arith.constant 1.000000e+00 : f32
      %96 = vector.broadcast %cst_86 : f32 to vector<8x128xf32>
      %97 = arith.addf %96, %95 : vector<8x128xf32>
      %98 = arith.divf %96, %97 : vector<8x128xf32>
      %99 = arith.mulf %90, %arg15 : vector<8x128xf32>
      %100 = arith.mulf %84, %92 : vector<8x128xf32>
      %101 = arith.addf %99, %100 : vector<8x128xf32>
      %102 = math.tanh %101 : vector<8x128xf32>
      %103 = arith.mulf %98, %102 : vector<8x128xf32>
      %104 = arith.truncf %103 : vector<8x128xf32> to vector<8x128xbf16>
      %105 = arith.index_cast %arg13 : i32 to index
      %c0_87 = arith.constant 0 : index
      %c0_88 = arith.constant 0 : index
      %106 = vector.load %arg11[%105, %c0_87, %c0_88] : memref<8x8x128xbf16, #tpu.memory_space<vmem>>, vector<1x8x128xbf16>
      %107 = vector.shape_cast %106 : vector<1x8x128xbf16> to vector<8x128xbf16>
      %108 = vector.shape_cast %104 : vector<8x128xbf16> to vector<1x8x128xbf16>
      tpu.vector_store %arg11[%105, %c0_87, %c0_88], %108 {strides = array<i32>} : memref<8x8x128xbf16, #tpu.memory_space<vmem>>, vector<1x8x128xbf16>,
      scf.yield %103, %101 : vector<8x128xf32>, vector<8x128xf32>
    }
    %c8_i32_46 = arith.constant 8 : i32
    %c2 = arith.constant 2 : index
    %c0_47 = arith.constant 0 : index
    %c0_48 = arith.constant 0 : index
    %43 = vector.load %arg6[%c2, %c0_47, %c0_48] : memref<3x128x512xbf16, #tpu.memory_space<vmem>>, vector<1x128x512xbf16>
    %44 = vector.shape_cast %43 : vector<1x128x512xbf16> to vector<128x512xbf16>
    %c0_49 = arith.constant 0 : index
    %c0_50 = arith.constant 0 : index
    %c0_51 = arith.constant 0 : index
    %45 = vector.load %arg11[%c0_49, %c0_50, %c0_51] : memref<8x8x128xbf16, #tpu.memory_space<vmem>>, vector<8x8x128xbf16>
    %46 = vector.shape_cast %45 : vector<8x8x128xbf16> to vector<64x128xbf16>
    %c2_52 = arith.constant 2 : index
    %c0_53 = arith.constant 0 : index
    %c0_54 = arith.constant 0 : index
    %47 = vector.load %arg5[%c2_52, %c0_53, %c0_54] : memref<3x128x512xbf16, #tpu.memory_space<vmem>>, vector<1x128x512xbf16>
    %48 = vector.shape_cast %47 : vector<1x128x512xbf16> to vector<128x512xbf16>
    %cst_55 = arith.constant dense<0.000000e+00> : vector<64x512xf32>
    %49 = tpu.matmul %46, %48, %cst_55 {dimension_numbers = #tpu.dot_dimension_numbers<[1], [0], [0], [1], [0, 0, 1, 1], [], []>} : vector<64x128xbf16>, vector<128x512xbf16>, vector<64x512xf32> -> vector<64x512xf32>
    %c2_56 = arith.constant 2 : index
    %c0_57 = arith.constant 0 : index
    %c0_58 = arith.constant 0 : index
    %50 = vector.load %arg7[%c2_56, %c0_57, %c0_58] : memref<3x1x512xf32, #tpu.memory_space<vmem>>, vector<1x1x512xf32>
    %51 = vector.shape_cast %50 : vector<1x1x512xf32> to vector<1x512xf32>
    %52 = vector.broadcast %51 : vector<1x512xf32> to vector<64x512xf32>
    %53 = arith.addf %49, %52 : vector<64x512xf32>
    %54 = vector.shape_cast %53 : vector<64x512xf32> to vector<8x8x512xf32>
    %c0_59 = arith.constant 0 : index
    %c0_60 = arith.constant 0 : index
    %c0_61 = arith.constant 0 : index
    %55 = vector.load %arg12[%c0_59, %c0_60, %c0_61] : memref<8x8x512xf32, #tpu.memory_space<vmem>>, vector<8x8x512xf32>
    tpu.vector_store %arg12[%c0_59, %c0_60, %c0_61], %54 {strides = array<i32>} : memref<8x8x512xf32, #tpu.memory_space<vmem>>, vector<8x8x512xf32>,
    %cst_62 = arith.constant 0.000000e+00 : f32
    %56 = vector.broadcast %cst_62 : f32 to vector<8x128xf32>
    %c0_i32_63 = arith.constant 0 : i32
    %c8_i32_64 = arith.constant 8 : i32
    %57 = arith.addi %c0_i32_63, %c8_i32_64 : i32
    %c1_i32_65 = arith.constant 1 : i32
    %58:2 = scf.for %arg13 = %c0_i32_63 to %57 step %c1_i32_65 iter_args(%arg14 = %56, %arg15 = %56) -> (vector<8x128xf32>, vector<8x128xf32>)  : i32 {
      %73 = arith.index_cast %arg13 : i32 to index
      %c0_81 = arith.constant 0 : index
      %c0_82 = arith.constant 0 : index
      %74 = vector.load %arg12[%73, %c0_81, %c0_82] : memref<8x8x512xf32, #tpu.memory_space<vmem>>, vector<1x8x512xf32>
      %75 = vector.shape_cast %74 : vector<1x8x512xf32> to vector<8x512xf32>
      %76 = arith.truncf %arg14 : vector<8x128xf32> to vector<8x128xbf16>
      %cst_83 = arith.constant dense<0.000000e+00> : vector<8x512xf32>
      %77 = tpu.matmul %76, %44, %cst_83 {dimension_numbers = #tpu.dot_dimension_numbers<[1], [0], [0], [1], [0, 0, 1, 1], [], []>} : vector<8x128xbf16>, vector<128x512xbf16>, vector<8x512xf32> -> vector<8x512xf32>
      %78 = arith.addf %75, %77 : vector<8x512xf32>
      %79 = vector.extract_strided_slice %78 {offsets = [0, 0], sizes = [8, 128], strides = [1, 1]} : vector<8x512xf32> to vector<8x128xf32>
      %80 = arith.negf %79 : vector<8x128xf32>
      %81 = math.exp %80 : vector<8x128xf32>
      %cst_84 = arith.constant 1.000000e+00 : f32
      %82 = vector.broadcast %cst_84 : f32 to vector<8x128xf32>
      %83 = arith.addf %82, %81 : vector<8x128xf32>
      %84 = arith.divf %82, %83 : vector<8x128xf32>
      %85 = vector.extract_strided_slice %78 {offsets = [0, 128], sizes = [8, 128], strides = [1, 1]} : vector<8x512xf32> to vector<8x128xf32>
      %86 = arith.negf %85 : vector<8x128xf32>
      %87 = math.exp %86 : vector<8x128xf32>
      %cst_85 = arith.constant 1.000000e+00 : f32
      %88 = vector.broadcast %cst_85 : f32 to vector<8x128xf32>
      %89 = arith.addf %88, %87 : vector<8x128xf32>
      %90 = arith.divf %88, %89 : vector<8x128xf32>
      %91 = vector.extract_strided_slice %78 {offsets = [0, 256], sizes = [8, 128], strides = [1, 1]} : vector<8x512xf32> to vector<8x128xf32>
      %92 = math.tanh %91 : vector<8x128xf32>
      %93 = vector.extract_strided_slice %78 {offsets = [0, 384], sizes = [8, 128], strides = [1, 1]} : vector<8x512xf32> to vector<8x128xf32>
      %94 = arith.negf %93 : vector<8x128xf32>
      %95 = math.exp %94 : vector<8x128xf32>
      %cst_86 = arith.constant 1.000000e+00 : f32
      %96 = vector.broadcast %cst_86 : f32 to vector<8x128xf32>
      %97 = arith.addf %96, %95 : vector<8x128xf32>
      %98 = arith.divf %96, %97 : vector<8x128xf32>
      %99 = arith.mulf %90, %arg15 : vector<8x128xf32>
      %100 = arith.mulf %84, %92 : vector<8x128xf32>
      %101 = arith.addf %99, %100 : vector<8x128xf32>
      %102 = math.tanh %101 : vector<8x128xf32>
      %103 = arith.mulf %98, %102 : vector<8x128xf32>
      %104 = arith.truncf %103 : vector<8x128xf32> to vector<8x128xbf16>
      %105 = arith.index_cast %arg13 : i32 to index
      %c0_87 = arith.constant 0 : index
      %c0_88 = arith.constant 0 : index
      %106 = vector.load %arg11[%105, %c0_87, %c0_88] : memref<8x8x128xbf16, #tpu.memory_space<vmem>>, vector<1x8x128xbf16>
      %107 = vector.shape_cast %106 : vector<1x8x128xbf16> to vector<8x128xbf16>
      %108 = vector.shape_cast %104 : vector<8x128xbf16> to vector<1x8x128xbf16>
      tpu.vector_store %arg11[%105, %c0_87, %c0_88], %108 {strides = array<i32>} : memref<8x8x128xbf16, #tpu.memory_space<vmem>>, vector<1x8x128xbf16>,
      scf.yield %103, %101 : vector<8x128xf32>, vector<8x128xf32>
    }
    %c8_i32_66 = arith.constant 8 : i32
    %c0_67 = arith.constant 0 : index
    %c0_68 = arith.constant 0 : index
    %c0_69 = arith.constant 0 : index
    %59 = vector.load %arg11[%c0_67, %c0_68, %c0_69] : memref<8x8x128xbf16, #tpu.memory_space<vmem>>, vector<8x8x128xbf16>
    %60 = arith.extf %59 : vector<8x8x128xbf16> to vector<8x8x128xf32>
    %c0_70 = arith.constant 0 : index
    %c0_71 = arith.constant 0 : index
    %c0_72 = arith.constant 0 : index
    %61 = vector.load %arg2[%c0_70, %c0_71, %c0_72] : memref<8x8x1xf32, #tpu.memory_space<vmem>>, vector<8x8x1xf32>
    %62 = vector.broadcast %61 : vector<8x8x1xf32> to vector<8x8x128xf32>
    %63 = arith.mulf %60, %62 : vector<8x8x128xf32>
    %64 = vector.shape_cast %63 : vector<8x8x128xf32> to vector<64x128xf32>
    %65 = arith.truncf %64 : vector<64x128xf32> to vector<64x128xbf16>
    %c0_73 = arith.constant 0 : index
    %c0_74 = arith.constant 0 : index
    %66 = vector.load %arg8[%c0_73, %c0_74] : memref<128x128xbf16, #tpu.memory_space<vmem>>, vector<128x128xbf16>
    %cst_75 = arith.constant dense<0.000000e+00> : vector<64x128xf32>
    %67 = tpu.matmul %65, %66, %cst_75 {dimension_numbers = #tpu.dot_dimension_numbers<[1], [0], [0], [1], [0, 0, 1, 1], [], []>} : vector<64x128xbf16>, vector<128x128xbf16>, vector<64x128xf32> -> vector<64x128xf32>
    %c0_76 = arith.constant 0 : index
    %c0_77 = arith.constant 0 : index
    %68 = vector.load %arg9[%c0_76, %c0_77] : memref<1x128xf32, #tpu.memory_space<vmem>>, vector<1x128xf32>
    %69 = vector.broadcast %68 : vector<1x128xf32> to vector<64x128xf32>
    %70 = arith.addf %67, %69 : vector<64x128xf32>
    %71 = vector.shape_cast %70 : vector<64x128xf32> to vector<8x8x128xf32>
    %c0_78 = arith.constant 0 : index
    %c0_79 = arith.constant 0 : index
    %c0_80 = arith.constant 0 : index
    %72 = vector.load %arg10[%c0_78, %c0_79, %c0_80] : memref<8x8x128xf32, #tpu.memory_space<vmem>>, vector<8x8x128xf32>
    tpu.vector_store %arg10[%c0_78, %c0_79, %c0_80], %71 {strides = array<i32>} : memref<8x8x128xf32, #tpu.memory_space<vmem>>, vector<8x8x128xf32>,
    return
  }
  func.func @transform_0(%arg0: i32) -> (i32, i32, i32) {
    %c0_i32 = arith.constant 0 : i32
    %c0_i32_0 = arith.constant 0 : i32
    %c0_i32_1 = arith.constant 0 : i32
    return %c0_i32, %arg0, %c0_i32_0 : i32, i32, i32
  }
  func.func @transform_1(%arg0: i32) -> (i32, i32, i32) {
    %c0_i32 = arith.constant 0 : i32
    %c0_i32_0 = arith.constant 0 : i32
    %c0_i32_1 = arith.constant 0 : i32
    return %c0_i32, %arg0, %c0_i32_0 : i32, i32, i32
  }
  func.func @transform_2(%arg0: i32) -> (i32, i32) {
    %c0_i32 = arith.constant 0 : i32
    %c0_i32_0 = arith.constant 0 : i32
    %c0_i32_1 = arith.constant 0 : i32
    return %c0_i32, %c0_i32_0 : i32, i32
  }
  func.func @transform_3(%arg0: i32) -> (i32, i32) {
    %c0_i32 = arith.constant 0 : i32
    %c0_i32_0 = arith.constant 0 : i32
    %c0_i32_1 = arith.constant 0 : i32
    return %c0_i32, %c0_i32_0 : i32, i32
  }
  func.func @transform_4(%arg0: i32) -> (i32, i32, i32) {
    %c0_i32 = arith.constant 0 : i32
    %c0_i32_0 = arith.constant 0 : i32
    %c0_i32_1 = arith.constant 0 : i32
    %c0_i32_2 = arith.constant 0 : i32
    return %c0_i32, %c0_i32_0, %c0_i32_1 : i32, i32, i32
  }
  func.func @transform_5(%arg0: i32) -> (i32, i32, i32) {
    %c0_i32 = arith.constant 0 : i32
    %c0_i32_0 = arith.constant 0 : i32
    %c0_i32_1 = arith.constant 0 : i32
    %c0_i32_2 = arith.constant 0 : i32
    return %c0_i32, %c0_i32_0, %c0_i32_1 : i32, i32, i32
  }
  func.func @transform_6(%arg0: i32) -> (i32, i32, i32) {
    %c0_i32 = arith.constant 0 : i32
    %c0_i32_0 = arith.constant 0 : i32
    %c0_i32_1 = arith.constant 0 : i32
    %c0_i32_2 = arith.constant 0 : i32
    return %c0_i32, %c0_i32_0, %c0_i32_1 : i32, i32, i32
  }
  func.func @transform_7(%arg0: i32) -> (i32, i32) {
    %c0_i32 = arith.constant 0 : i32
    %c0_i32_0 = arith.constant 0 : i32
    %c0_i32_1 = arith.constant 0 : i32
    return %c0_i32, %c0_i32_0 : i32, i32
  }
  func.func @transform_8(%arg0: i32) -> (i32, i32) {
    %c0_i32 = arith.constant 0 : i32
    %c0_i32_0 = arith.constant 0 : i32
    %c0_i32_1 = arith.constant 0 : i32
    return %c0_i32, %c0_i32_0 : i32, i32
  }
  func.func @transform_9(%arg0: i32) -> (i32, i32, i32) {
    %c0_i32 = arith.constant 0 : i32
    %c0_i32_0 = arith.constant 0 : i32
    %c0_i32_1 = arith.constant 0 : i32
    return %c0_i32, %arg0, %c0_i32_0 : i32, i32, i32
  }
}

</mosaic_0001>

<bundles_post_ra>
// kernel: network_forward.1
= control target key start
LH: loop header
LB: loop body
LE: loop exit
PB: predicated region body
PF: predicated region fallthrough
CT: control target
= control target key end

     0   :  { %s4131_s26 = smov 0   ;;  %s5099_s1 = inlined_call_operand.vmem [shape: f32[8,8,1], index: 1, kind: input, shape index: {}]   ;;  %s5100_s2 = inlined_call_operand.vmem [shape: bf16[128,128], index: 2, kind: input, shape index: {}]   ;;  %s5101_s7 = inlined_call_operand.vmem [shape: bf16[128,128], index: 7, kind: input, shape index: {}]   ;;  %s5102_s8 = inlined_call_operand.vmem [shape: f32[1,128], index: 8, kind: input, shape index: {}]   ;;  %s5103_s9 = inlined_call_operand.vmem [shape: f32[8,8,128], index: 9, kind: output, shape index: {}]   ;;  %s5104_s0 = inlined_call_operand.vmem [shape: bf16[8,8,128], index: 0, kind: input, shape index: {}]   ;;  %s5105_s4 = inlined_call_operand.vmem [shape: bf16[3,128,512], index: 4, kind: input, shape index: {}]   ;;  %s5106_s5 = inlined_call_operand.vmem [shape: bf16[3,128,512], index: 5, kind: input, shape index: {}]   ;;  %s5107_s3 = inlined_call_operand.vmem [shape: f32[1,128], index: 3, kind: input, shape index: {}]   ;;  %s5108_s6 = inlined_call_operand.vmem [shape: f32[3,1,512], index: 6, kind: input, shape index: {}]  }
   0x1   :  { %v3337_v0 = vld [vmem:[%s5100_s2 + $0x38] sm:$0xff]   ;;  %v3338_v1 = vld [vmem:[%s5100_s2 + $0x30] sm:$0xff]   ;;  %v3339_v2 = vld [vmem:[%s5100_s2 + $0x28] sm:$0xff]  }
   0x2   :  { %3181 = vmatprep.subr.bf16.mxu0 %v3337_v0  ;;  %v3340_v3 = vld [vmem:[%s5100_s2 + $0x20] sm:$0xff]   ;;  %v3341_v5 = vld [vmem:[%s5100_s2 + $0x18] sm:$0xff]   ;;  %v3342_v6 = vld [vmem:[%s5100_s2 + $0x10] sm:$0xff]  }
   0x3   :  { %3182 = vmatpush3.bf16.msra.mxu0 %v3337_v0  ;;  %v3345_v4 = vld [vmem:[%s5104_s0] sm:$0xff]   ;;  %v3343_v7 = vld [vmem:[%s5100_s2 + $0x8] sm:$0xff]   ;;  %v3347_v10 = vld [vmem:[%s5104_s0 + $0x10] sm:$0xff]  }
   0x4   :  { %3183 = vmatprep.subr.bf16.mxu0 %v3338_v1  ;;  %3197 = vmatprep.mubr.bf16.mxu0 %v3345_v4  ;;  %v3344_v8 = vld [vmem:[%s5100_s2] sm:$0xff]   ;;  %v3346_v9 = vld [vmem:[%s5104_s0 + $0x8] sm:$0xff]   ;;  %v3348_v11 = vld [vmem:[%s5104_s0 + $0x18] sm:$0xff]  }
   0x5   :  { %v3349_v12 = vld [vmem:[%s5105_s4 + $0xe4] ss:$16 sps:$4 sm:$0xff]   ;;  %v3351_v13 = vld [vmem:[%s5105_s4 + $0xe0] ss:$16 sps:$4 sm:$0xff]   ;;  %v3750_v14 = vld [vmem:[%s5105_s4 + $0xe8] ss:$16 sps:$4 sm:$0xff]  }
   0x6   :  { %v3755_v15 = vld [vmem:[%s5105_s4 + $0xec] ss:$16 sps:$4 sm:$0xff]   ;;  %503 = vmatprep.subr.bf16.mxu1 %v3349_v12  ;;  %v3355_v16 = vld [vmem:[%s5105_s4 + $0xc4] ss:$16 sps:$4 sm:$0xff]   ;;  %v3357_v50 = vld [vmem:[%s5105_s4 + $0xc0] ss:$16 sps:$4 sm:$0xff]  }
   0x7   :  { %3184 = vmatpush3.bf16.msra.mxu0 %v3338_v1  ;;  %504 = vmatpush1.bf16.msra.mxu1 %v3351_v13  ;;  %v3764_v17 = vld [vmem:[%s5105_s4 + $0xcc] ss:$16 sps:$4 sm:$0xff]   ;;  %v3769_v18 = vld [vmem:[%s5106_s5] sm:$0xff]  ;;  %v3779_v20 = vld [vmem:[%s5106_s5 + $0x10] sm:$0xff] }
   0x8   :  { %3185 = vmatprep.subr.bf16.mxu0 %v3339_v2  ;;  %v3774_v19 = vld [vmem:[%s5106_s5 + $0x8] sm:$0xff]  ;;  %v3785_v21 = vld [vmem:[%s5106_s5 + $0x18] sm:$0xff]  ;;  %v3790_v22 = vld [vmem:[%s5106_s5 + $0x20] sm:$0xff]  ;;  %505 = vmatprep.subr.bf16.mxu1 %v3355_v16 }
   0x9   :  { %5115 = vst [vmem:[#allocation4_spill] sm:$0xff] %v3774_v19  ;;  %v3795_v23 = vld [vmem:[%s5106_s5 + $0x28] sm:$0xff]  ;;  %v3801_v24 = vld [vmem:[%s5106_s5 + $0x30] sm:$0xff]  ;;  %v3806_v25 = vld [vmem:[%s5106_s5 + $0x38] sm:$0xff] }
   0xa   :  { %v3811_v26 = vld [vmem:[%s5106_s5 + $0x40] sm:$0xff]  ;;  %v3816_v27 = vld [vmem:[%s5106_s5 + $0x48] sm:$0xff]  ;;  %v3821_v28 = vld [vmem:[%s5106_s5 + $0x50] sm:$0xff] }
   0xb   :  { %3186 = vmatpush3.bf16.msra.mxu0 %v3339_v2  ;;  %v3826_v29 = vld [vmem:[%s5106_s5 + $0x58] sm:$0xff]  ;;  %v3831_v30 = vld [vmem:[%s5106_s5 + $0x60] sm:$0xff]  ;;  %v3836_v31 = vld [vmem:[%s5106_s5 + $0x68] sm:$0xff]  ;;  %506 = vmatpush1.bf16.msra.mxu1 %v3357_v50 }
   0xc   :  { %3187 = vmatprep.subr.bf16.mxu0 %v3340_v3  ;;  %v3841_v32 = vld [vmem:[%s5106_s5 + $0x70] sm:$0xff]  ;;  %v3846_v33 = vld [vmem:[%s5106_s5 + $0x78] sm:$0xff]  ;;  %v3851_v34 = vld [vmem:[%s5106_s5 + $0x80] sm:$0xff] }
   0xd   :  { %v3856_v35 = vld [vmem:[%s5106_s5 + $0x88] sm:$0xff]  ;;  %v3861_v36 = vld [vmem:[%s5106_s5 + $0x90] sm:$0xff]  ;;  %v3866_v37 = vld [vmem:[%s5106_s5 + $0x98] sm:$0xff] }
   0xe   :  { %v3871_v38 = vld [vmem:[%s5106_s5 + $0xa0] sm:$0xff]  ;;  %v3876_v39 = vld [vmem:[%s5106_s5 + $0xa8] sm:$0xff]  ;;  %v3881_v40 = vld [vmem:[%s5106_s5 + $0xb0] sm:$0xff] }
   0xf   :  { %3188 = vmatpush3.bf16.msra.mxu0 %v3340_v3  ;;  %v3886_v41 = vld [vmem:[%s5106_s5 + $0xb8] sm:$0xff]  ;;  %v3891_v42 = vld [vmem:[%s5106_s5 + $0xc0] sm:$0xff]  ;;  %v3896_v43 = vld [vmem:[%s5106_s5 + $0xc8] sm:$0xff] }
  0x10   :  { %3189 = vmatprep.subr.bf16.mxu0 %v3341_v5  ;;  %v3901_v44 = vld [vmem:[%s5106_s5 + $0xd0] sm:$0xff]  ;;  %v3906_v45 = vld [vmem:[%s5106_s5 + $0xd8] sm:$0xff]  ;;  %v3911_v46 = vld [vmem:[%s5106_s5 + $0xe0] sm:$0xff] }
  0x11   :  { %v3916_v47 = vld [vmem:[%s5106_s5 + $0xe8] sm:$0xff]  ;;  %v3921_v48 = vld [vmem:[%s5106_s5 + $0xf0] sm:$0xff]  ;;  %v3926_v49 = vld [vmem:[%s5106_s5 + $0xf8] sm:$0xff] }
  0x12   :  { %v3934_v51 = vld [vmem:[%s5105_s4 + $0xc8] ss:$16 sps:$4 sm:$0xff]   ;;  %v3361_v52 = vld [vmem:[%s5105_s4 + $0xa4] ss:$16 sps:$4 sm:$0xff]   ;;  %v3363_v53 = vld [vmem:[%s5105_s4 + $0xa0] ss:$16 sps:$4 sm:$0xff]  }
  0x13   :  { %3190 = vmatpush3.bf16.msra.mxu0 %v3341_v5  ;;  %v3946_v54 = vld [vmem:[%s5105_s4 + $0xa8] ss:$16 sps:$4 sm:$0xff]   ;;  %v3951_v55 = vld [vmem:[%s5105_s4 + $0xac] ss:$16 sps:$4 sm:$0xff]   ;;  %507 = vmatprep.subr.bf16.mxu1 %v3361_v52  ;;  %v3367_v56 = vld [vmem:[%s5105_s4 + $0x84] ss:$16 sps:$4 sm:$0xff]  }
  0x14   :  { %3191 = vmatprep.subr.bf16.mxu0 %v3342_v6  ;;  %508 = vmatpush1.bf16.msra.mxu1 %v3363_v53  ;;  %v3369_v57 = vld [vmem:[%s5105_s4 + $0x80] ss:$16 sps:$4 sm:$0xff]   ;;  %v3963_v58 = vld [vmem:[%s5105_s4 + $0x8c] ss:$16 sps:$4 sm:$0xff]   ;;  %v3969_v59 = vld [vmem:[%s5105_s4 + $0x88] ss:$16 sps:$4 sm:$0xff]  }
  0x15   :  { %509 = vmatprep.subr.bf16.mxu1 %v3367_v56  ;;  %v3373_v60 = vld [vmem:[%s5105_s4 + $0x64] ss:$16 sps:$4 sm:$0xff]   ;;  %v3978_v61 = vld [vmem:[%s5105_s4 + $0x6c] ss:$16 sps:$4 sm:$0xff]   ;;  %v3375_v62 = vld [vmem:[%s5105_s4 + $0x60] ss:$16 sps:$4 sm:$0xff]  }
  0x16   :  { %v3987_v63 = vld [vmem:[%s5105_s4 + $0x68] ss:$16 sps:$4 sm:$0xff]   ;;  %v3379_v0 = vld [vmem:[%s5105_s4 + $0x44] ss:$16 sps:$4 sm:$0xff]   ;;  %v3996_v1 = vld [vmem:[%s5105_s4 + $0x4c] ss:$16 sps:$4 sm:$0xff]  }
  0x17   :  { %3192 = vmatpush3.bf16.msra.mxu0 %v3342_v6  ;;  %v3381_v2 = vld [vmem:[%s5105_s4 + $0x40] ss:$16 sps:$4 sm:$0xff]   ;;  %v4005_v3 = vld [vmem:[%s5105_s4 + $0x48] ss:$16 sps:$4 sm:$0xff]   ;;  %v3385_v4 = vld [vmem:[%s5105_s4 + $0x24] ss:$16 sps:$4 sm:$0xff]  }
  0x18   :  { %3193 = vmatprep.subr.bf16.mxu0 %v3343_v7  ;;  %510 = vmatpush1.bf16.msra.mxu1 %v3369_v57  ;;  %v4014_v5 = vld [vmem:[%s5105_s4 + $0x2c] ss:$16 sps:$4 sm:$0xff]   ;;  %v3387_v6 = vld [vmem:[%s5105_s4 + $0x20] ss:$16 sps:$4 sm:$0xff]   ;;  %v4043_v12 = vld [vmem:[%s5105_s4 + $0x8] ss:$16 sps:$4 sm:$0xff]  }
  0x19   :  { %511 = vmatprep.subr.bf16.mxu1 %v3373_v60  ;;  %v2738_v13 = vld [vmem:[%s5107_s3] ss:$0 sm:$0xff] }
  0x1b   :  { %3194 = vmatpush3.bf16.msra.mxu0 %v3343_v7  ;;  %v5109_v7 = vmov 0  }
  0x1c   :  { %3195 = vmatprep.subr.bf16.mxu0 %v3344_v8  ;;  %512 = vmatpush1.bf16.msra.mxu1 %v3375_v62 }
  0x1d   :  { %513 = vmatprep.subr.bf16.mxu1 %v3379_v0  ;;  %535 = vmatprep.mubr.bf16.mxu1 %v5109_v7 }
  0x1f   :  { %3196 = vmatpush3.bf16.msra.mxu0 %v3344_v8  ;;  %v4024_v8 = vld [vmem:[%s5105_s4 + $0x28] ss:$16 sps:$4 sm:$0xff]  }
  0x20   :  { %576 = vmatprep.subr.bf16.mxu0 %v3755_v15  ;;  %514 = vmatpush1.bf16.msra.mxu1 %v3381_v2 }
  0x21   :  { %515 = vmatprep.subr.bf16.mxu1 %v3385_v4 }
  0x22   :  { %3198 = vmatmul.mubr.bf16.vlgmr.msra.gmra.mxu0 %v3346_v9  ;;  %v3391_v9 = vld [vmem:[%s5105_s4 + $0x4] ss:$16 sps:$4 sm:$0xff]  }
  0x23   :  { %3201 = vmatprep.mubr.bf16.mxu0 %v3347_v10  ;;  %577 = vmatpush1.bf16.msra.mxu0 %v3750_v14  ;;  %v4033_v10 = vld [vmem:[%s5105_s4 + $0xc] ss:$16 sps:$4 sm:$0xff]  }
  0x24   :  { %578 = vmatprep.subr.bf16.mxu0 %v3764_v17  ;;  %516 = vmatpush1.bf16.msra.mxu1 %v3387_v6 }
  0x25   :  { %517 = vmatprep.subr.bf16.mxu1 %v3391_v9 }
  0x27   :  { %579 = vmatpush1.bf16.msra.mxu0 %v3934_v51 }
  0x28   :  { %580 = vmatprep.subr.bf16.mxu0 %v3951_v55 }
  0x2a   :  { %3202 = vmatmul.mubr.bf16.gmra.mxu0 %v3348_v11  ;;  %v3393_v11 = vld [vmem:[%s5105_s4] ss:$16 sps:$4 sm:$0xff]  }
  0x2b   :  { %581 = vmatpush1.bf16.msra.mxu0 %v3946_v54  ;;  %608 = vmatprep.mubr.bf16.mxu0 %v5109_v7 }
  0x2c   :  { %582 = vmatprep.subr.bf16.mxu0 %v3963_v58  ;;  %518 = vmatpush1.bf16.msra.mxu1 %v3393_v11 }
  0x2d   :  { %3229 = vmatprep.subr.bf16.mxu1 %v3755_v15 }
  0x2f   :  { %583 = vmatpush1.bf16.msra.mxu0 %v3969_v59 }
  0x30   :  { %584 = vmatprep.subr.bf16.mxu0 %v3978_v61 }
  0x33   :  { %585 = vmatpush1.bf16.msra.mxu0 %v3987_v63 }
  0x34   :  { %586 = vmatprep.subr.bf16.mxu0 %v3996_v1 }
  0x37   :  { %587 = vmatpush1.bf16.msra.mxu0 %v4005_v3 }
  0x38   :  { %588 = vmatprep.subr.bf16.mxu0 %v4014_v5 }
  0x3b   :  { %589 = vmatpush1.bf16.msra.mxu0 %v4024_v8 }
  0x3c   :  { %590 = vmatprep.subr.bf16.mxu0 %v4033_v10 }
  0x3f   :  { %591 = vmatpush1.bf16.msra.mxu0 %v4043_v12 }
  0xe2   :  { %v3199_v16 = vpop.f32.mrf.mxu0 }
  0xe3   :  { %v179_v50 = vadd.f32 %v3199_v16, %v2738_v13 }
  0xe4   :  { %v170_v52 = vpop.f32.mrf.mxu0 }
  0xe5   :  { %v171_v53 = vadd.f32 %v2738_v13, %v170_v52  ;;  %3401 = vtanh.f32 %v179_v50 }
  0xe6   :  { %v3200_v56 = vpop.f32.mrf.mxu0 }
  0xe7   :  { %v182_v57 = vadd.f32 %v3200_v56, %v2738_v13 }
  0xe8   :  { %v173_v60 = vpop.f32.mrf.mxu0 }
  0xe9   :  { %3403 = vtanh.f32 %v182_v57  ;;  %v174_v62 = vadd.f32 %v2738_v13, %v173_v60 }
  0xea   :  { %3405 = vtanh.f32 %v171_v53  ;;  %v3203_v0 = vpop.f32.mrf.mxu0 }
  0xeb   :  { %3407 = vtanh.f32 %v174_v62  ;;  %v195_v2 = vadd.f32 %v3203_v0, %v2738_v13 }
  0xec   :  { %v186_v4 = vpop.f32.mrf.mxu0 }
  0xed   :  { %v187_v15 = vadd.f32 %v2738_v13, %v186_v4  ;;  %3409 = vtanh.f32 %v195_v2 }
  0xee   :  { %v3204_v6 = vpop.f32.mrf.mxu0 }
  0xef   :  { %v198_v9 = vadd.f32 %v3204_v6, %v2738_v13  ;;  %3411 = vtanh.f32 %v187_v15 }
  0xf0   :  { %v189_v11 = vpop.f32.mrf.mxu0 }
  0xf1   :  { %3413 = vtanh.f32 %v198_v9  ;;  %v190_v16 = vadd.f32 %v2738_v13, %v189_v11  ;;  %v5116_v13 = vmov 0  }
  0xf2   :  { %v3402_v52 = vpop.eup %3401 }
  0xf3   :  { %3415 = vtanh.f32 %v190_v16 }
  0xf6   :  { %v3404_v56 = vpop.eup %3403 }
  0xf7   :  { %v3406_v50 = vpop.eup %3405  ;;  %v3123_v7 = vpack.c.bf16 %v3404_v56, %v3402_v52 }
  0xf8   :  { %v3408_v57 = vpop.eup %3407 }
  0xf9   :  { %3151 = vst [vmem:[#allocation2 + $0x8] sm:$0xff] %v3123_v7   ;;  %v3118_v53 = vpack.c.bf16 %v3408_v57, %v3406_v50 }
  0xfa   :  { %v3410_v60 = vpop.eup %3409 }
  0xfb   :  { %3119 = vst [vmem:[#allocation2] sm:$0xff] %v3118_v53  }
  0xfc   :  { %v3412_v62 = vpop.eup %3411 }
  0xfe   :  { %v3414_v0 = vpop.eup %3413 }
  0xff   :  { %v3133_v4 = vpack.c.bf16 %v3414_v0, %v3410_v60 }
 0x100   :  { %v3416_v19 = vpop.eup %3415  ;;  %v3398_v7 = vld [vmem:[#allocation2 + $0x8] sm:$0xff]  }
 0x101   :  { %3153 = vst [vmem:[#allocation2 + $0x18] sm:$0xff] %v3133_v4   ;;  %v3128_v2 = vpack.c.bf16 %v3416_v19, %v3412_v62  ;;  %v299_v19 = vlaneseq }
 0x102   :  { %v3397_v15 = vld [vmem:[#allocation2] sm:$0xff]  }
 0x103   :  { %3152 = vst [vmem:[#allocation2 + $0x10] sm:$0xff] %v3128_v2   ;;  %536 = vmatmul.mubr.bf16.vlgmr.msra.gmra.mxu1 %v3397_v15  ;;  %609 = vmatmul.mubr.bf16.vlgmr.msra.gmra.mxu0 %v3397_v15 }
 0x104   :  { %3237 = vmatpush1.bf16.msra.mxu1 %v3750_v14  ;;  %545 = vmatprep.mubr.bf16.mxu1 %v5116_v13 }
 0x105   :  { %3230 = vmatprep.subr.bf16.mxu1 %v3764_v17  ;;  %618 = vmatprep.mubr.bf16.mxu0 %v5116_v13 }
 0x108   :  { %3238 = vmatpush1.bf16.msra.mxu1 %v3934_v51  ;;  %v3400_v17 = vld [vmem:[#allocation2 + $0x18] sm:$0xff]   ;;  %v300_v51 = vshrl.u32 %v299_v19, 7 }
 0x109   :  { %3231 = vmatprep.subr.bf16.mxu1 %v3951_v55 }
 0x10a   :  { %v3399_v14 = vld [vmem:[#allocation2 + $0x10] sm:$0xff]   ;;  %v4074_v55 = vsub.s32 2, %v300_v51 }
 0x10b   :  { %546 = vmatmul.mubr.bf16.gmra.mxu1 %v3398_v7  ;;  %619 = vmatmul.mubr.bf16.gmra.mxu0 %v3398_v7 }
 0x10c   :  { %3239 = vmatpush1.bf16.msra.mxu1 %v3946_v54  ;;  %555 = vmatprep.mubr.bf16.mxu1 %v5116_v13  ;;  %v4072_v54 = vsub.s32 0, %v300_v51 }
 0x10d   :  { %3232 = vmatprep.subr.bf16.mxu1 %v3963_v58  ;;  %v297_v58 = vld [vmem:[%s5108_s6] sm:$0xf] }
 0x110   :  { %3240 = vmatpush1.bf16.msra.mxu1 %v3969_v59  ;;  %v4079_v59 = vsub.s32 1, %v300_v51 }
 0x111   :  { %3233 = vmatprep.subr.bf16.mxu1 %v3978_v61  ;;  %v4081_v61 = vsub.s32 3, %v300_v51 }
 0x113   :  { %556 = vmatmul.mubr.bf16.gmra.mxu1 %v3399_v14 }
 0x114   :  { %3241 = vmatpush1.bf16.msra.mxu1 %v3987_v63  ;;  %565 = vmatprep.mubr.bf16.mxu1 %v5116_v13  ;;  %v4084_v63 = vrot.slane %v297_v58, %v4072_v54 }
 0x115   :  { %3234 = vmatprep.subr.bf16.mxu1 %v3996_v1  ;;  %v4087_v1 = vrot.slane %v297_v58, %v4074_v55 }
 0x118   :  { %3242 = vmatpush1.bf16.msra.mxu1 %v4005_v3  ;;  %v4090_v3 = vrot.slane %v297_v58, %v4079_v59 }
 0x119   :  { %3235 = vmatprep.subr.bf16.mxu1 %v4014_v5  ;;  %v4093_v5 = vrot.slane %v297_v58, %v4081_v61 }
 0x11b   :  { %566 = vmatmul.mubr.bf16.gmra.mxu1 %v3400_v17 }
 0x11c   :  { %3243 = vmatpush1.bf16.msra.mxu1 %v4024_v8  ;;  %628 = vmatprep.mubr.bf16.mxu1 %v5116_v13 }
 0x11d   :  { %3236 = vmatprep.subr.bf16.mxu1 %v4033_v10 }
 0x120   :  { %3244 = vmatpush1.bf16.msra.mxu1 %v4043_v12 }
 0x123   :  { %629 = vmatmul.mubr.bf16.vlgmr.msra.gmra.mxu1 %v3399_v14 }
 0x124   :  { %638 = vmatprep.mubr.bf16.mxu1 %v5116_v13 }
 0x12b   :  { %639 = vmatmul.mubr.bf16.gmra.mxu1 %v3400_v17 }
 0x1c3   :  { %v537_v8 = vpop.f32.mrf.mxu1  ;;  %v610_v10 = vpop.f32.mrf.mxu0 }
 0x1c4   :  { %v538_v12 = vadd.f32 %v537_v8, %v4084_v63  ;;  %v611_v6 = vadd.f32 %v610_v10, %v4087_v1 }
 0x1c5   :  { %v539_v9 = vpop.f32.mrf.mxu1  ;;  %v612_v11 = vpop.f32.mrf.mxu0 }
 0x1c6   :  { %649 = vst [vmem:[#allocation3] sm:$0xff] %v538_v12  ;;  %651 = vst [vmem:[#allocation3 + $0x10] sm:$0xff] %v611_v6  ;;  %v540_v16 = vadd.f32 %v539_v9, %v4090_v3  ;;  %v613_v52 = vadd.f32 %v612_v11, %v4093_v5 }
 0x1c7   :  { %v541_v56 = vpop.f32.mrf.mxu1  ;;  %v614_v50 = vpop.f32.mrf.mxu0 }
 0x1c8   :  { %650 = vst [vmem:[#allocation3 + $0x8] sm:$0xff] %v540_v16  ;;  %652 = vst [vmem:[#allocation3 + $0x18] sm:$0xff] %v613_v52  ;;  %v542_v57 = vadd.f32 %v541_v56, %v4084_v63  ;;  %v615_v53 = vadd.f32 %v614_v50, %v4087_v1 }
 0x1c9   :  { %v543_v60 = vpop.f32.mrf.mxu1  ;;  %v616_v62 = vpop.f32.mrf.mxu0 }
 0x1ca   :  { %653 = vst [vmem:[#allocation3 + $0x20] sm:$0xff] %v542_v57  ;;  %655 = vst [vmem:[#allocation3 + $0x30] sm:$0xff] %v615_v53  ;;  %v544_v0 = vadd.f32 %v543_v60, %v4090_v3  ;;  %v617_v4 = vadd.f32 %v616_v62, %v4093_v5 }
 0x1cb   :  { %v547_v2 = vpop.f32.mrf.mxu1  ;;  %v620_v15 = vpop.f32.mrf.mxu0 }
 0x1cc   :  { %654 = vst [vmem:[#allocation3 + $0x28] sm:$0xff] %v544_v0  ;;  %656 = vst [vmem:[#allocation3 + $0x38] sm:$0xff] %v617_v4  ;;  %v548_v13 = vadd.f32 %v547_v2, %v4084_v63  ;;  %v621_v7 = vadd.f32 %v620_v15, %v4087_v1 }
 0x1cd   :  { %v549_v14 = vpop.f32.mrf.mxu1  ;;  %v622_v17 = vpop.f32.mrf.mxu0 }
 0x1ce   :  { %657 = vst [vmem:[#allocation3 + $0x40] sm:$0xff] %v548_v13  ;;  %659 = vst [vmem:[#allocation3 + $0x50] sm:$0xff] %v621_v7  ;;  %v550_v19 = vadd.f32 %v549_v14, %v4090_v3  ;;  %v623_v51 = vadd.f32 %v622_v17, %v4093_v5 }
 0x1cf   :  { %v551_v58 = vpop.f32.mrf.mxu1  ;;  %v624_v8 = vpop.f32.mrf.mxu0 }
 0x1d0   :  { %658 = vst [vmem:[#allocation3 + $0x48] sm:$0xff] %v550_v19  ;;  %660 = vst [vmem:[#allocation3 + $0x58] sm:$0xff] %v623_v51  ;;  %v552_v10 = vadd.f32 %v551_v58, %v4084_v63  ;;  %v625_v12 = vadd.f32 %v624_v8, %v4087_v1 }
 0x1d1   :  { %v553_v6 = vpop.f32.mrf.mxu1  ;;  %v626_v9 = vpop.f32.mrf.mxu0 }
 0x1d2   :  { %661 = vst [vmem:[#allocation3 + $0x60] sm:$0xff] %v552_v10  ;;  %663 = vst [vmem:[#allocation3 + $0x70] sm:$0xff] %v625_v12  ;;  %v554_v11 = vadd.f32 %v553_v6, %v4090_v3  ;;  %v627_v16 = vadd.f32 %v626_v9, %v4093_v5 }
 0x1d3   :  { %v557_v52 = vpop.f32.mrf.mxu1 }
 0x1d4   :  { %662 = vst [vmem:[#allocation3 + $0x68] sm:$0xff] %v554_v11  ;;  %664 = vst [vmem:[#allocation3 + $0x78] sm:$0xff] %v627_v16  ;;  %v558_v56 = vadd.f32 %v557_v52, %v4084_v63 }
 0x1d5   :  { %v559_v50 = vpop.f32.mrf.mxu1 }
 0x1d6   :  { %665 = vst [vmem:[#allocation3 + $0x80] sm:$0xff] %v558_v56  ;;  %v560_v57 = vadd.f32 %v559_v50, %v4090_v3 }
 0x1d7   :  { %v561_v53 = vpop.f32.mrf.mxu1 }
 0x1d8   :  { %666 = vst [vmem:[#allocation3 + $0x88] sm:$0xff] %v560_v57  ;;  %v562_v60 = vadd.f32 %v561_v53, %v4084_v63 }
 0x1d9   :  { %v563_v62 = vpop.f32.mrf.mxu1 }
 0x1da   :  { %669 = vst [vmem:[#allocation3 + $0xa0] sm:$0xff] %v562_v60  ;;  %v564_v0 = vadd.f32 %v563_v62, %v4090_v3  ;;  %v4127_v60 = vmov 0.0   ;;  %v4129_v62 = vmov 0.0  }
 0x1db   :  { %v567_v4 = vpop.f32.mrf.mxu1 }
 0x1dc   :  { %670 = vst [vmem:[#allocation3 + $0xa8] sm:$0xff] %v564_v0  ;;  %v568_v2 = vadd.f32 %v567_v4, %v4084_v63 }
 0x1dd   :  { %v569_v15 = vpop.f32.mrf.mxu1 }
 0x1de   :  { %673 = vst [vmem:[#allocation3 + $0xc0] sm:$0xff] %v568_v2  ;;  %v570_v13 = vadd.f32 %v569_v15, %v4090_v3 }
 0x1df   :  { %v571_v7 = vpop.f32.mrf.mxu1 }
 0x1e0   :  { %674 = vst [vmem:[#allocation3 + $0xc8] sm:$0xff] %v570_v13  ;;  %v572_v14 = vadd.f32 %v571_v7, %v4084_v63 }
 0x1e1   :  { %v573_v17 = vpop.f32.mrf.mxu1 }
 0x1e2   :  { %677 = vst [vmem:[#allocation3 + $0xe0] sm:$0xff] %v572_v14  ;;  %v574_v19 = vadd.f32 %v573_v17, %v4090_v3 }
 0x1e3   :  { %v630_v51 = vpop.f32.mrf.mxu1 }
 0x1e4   :  { %678 = vst [vmem:[#allocation3 + $0xe8] sm:$0xff] %v574_v19  ;;  %v631_v58 = vadd.f32 %v630_v51, %v4087_v1 }
 0x1e5   :  { %v632_v8 = vpop.f32.mrf.mxu1 }
 0x1e6   :  { %667 = vst [vmem:[#allocation3 + $0x90] sm:$0xff] %v631_v58  ;;  %v633_v10 = vadd.f32 %v632_v8, %v4093_v5 }
 0x1e7   :  { %v634_v12 = vpop.f32.mrf.mxu1 }
 0x1e8   :  { %668 = vst [vmem:[#allocation3 + $0x98] sm:$0xff] %v633_v10  ;;  %v635_v6 = vadd.f32 %v634_v12, %v4087_v1 }
 0x1e9   :  { %v636_v9 = vpop.f32.mrf.mxu1 }
 0x1ea   :  { %671 = vst [vmem:[#allocation3 + $0xb0] sm:$0xff] %v635_v6  ;;  %v637_v63 = vadd.f32 %v636_v9, %v4093_v5 }
 0x1eb   :  { %v640_v11 = vpop.f32.mrf.mxu1 }
 0x1ec   :  { %672 = vst [vmem:[#allocation3 + $0xb8] sm:$0xff] %v637_v63  ;;  %v641_v3 = vadd.f32 %v640_v11, %v4087_v1 }
 0x1ed   :  { %v642_v16 = vpop.f32.mrf.mxu1 }
 0x1ee   :  { %675 = vst [vmem:[#allocation3 + $0xd0] sm:$0xff] %v641_v3  ;;  %v643_v52 = vadd.f32 %v642_v16, %v4093_v5 }
 0x1ef   :  { %v644_v56 = vpop.f32.mrf.mxu1 }
 0x1f0   :  { %676 = vst [vmem:[#allocation3 + $0xd8] sm:$0xff] %v643_v52  ;;  %v645_v50 = vadd.f32 %v644_v56, %v4087_v1 }
 0x1f1   :  { %v646_v57 = vpop.f32.mrf.mxu1 }
 0x1f2   :  { %679 = vst [vmem:[#allocation3 + $0xf0] sm:$0xff] %v645_v50  ;;  %v647_v53 = vadd.f32 %v646_v57, %v4093_v5 }
 0x1f4   :  { %680 = vst [vmem:[#allocation3 + $0xf8] sm:$0xff] %v647_v53 }
 0x1f5 LB: > { %v2818_v1 = vcombine.high %v3911_v46, %v3921_v48  ;;  %v2817_v5 = vcombine.low %v3911_v46, %v3921_v48  ;;  %v2814_v0 = vcombine.high %v3891_v42, %v3901_v44  ;;  %v2820_v4 = vcombine.high %v3916_v47, %v3926_v49  ;;  %s3112_s27 = sshll.u32 %s3625_s26, 5  ;;  %s2824_s29 = sshll.u32 %s3625_s26, 2  ;;  %s3625_s26 = sphi %s4131_s26, %s686_s26   ;;  %v3621_v62 = vphi %v4129_v62, %v966_v62   ;;  %v3617_v60 = vphi %v4127_v60, %v964_v60  }
 0x1f6   : > { %v2819_v2 = vcombine.low %v3916_v47, %v3926_v49  ;;  %v2816_v15 = vcombine.high %v3896_v43, %v3906_v45  ;;  %v2813_v13 = vcombine.low %v3891_v42, %v3901_v44  ;;  %v2810_v7 = vcombine.high %v3871_v38, %v3881_v40  ;;  %s691_s28 = scalar_lea.vmem [#allocation3], %s3112_s27  ;;  %s969_s30 = scalar_lea.vmem [#allocation2], %s2824_s29 }
 0x1f7   : > { %857 = vmatprep.subr.bf16.mxu0 %v2818_v1  ;;  %898 = vmatprep.subr.bf16.mxu1 %v2820_v4  ;;  %v2815_v14 = vcombine.low %v3896_v43, %v3906_v45  ;;  %v2812_v17 = vcombine.high %v3876_v39, %v3886_v41  ;;  %v3652_v19 = vmov 0   ;;  %v2809_v51 = vcombine.low %v3871_v38, %v3881_v40  ;;  %v5117_v4 = vld [vmem:[#allocation4_spill] sm:$0xff]  ;;  %s686_s26 = sadd.s32 1, %s3625_s26  }
 0x1f8   : > { %858 = vmatpush1.bf16.msra.mxu0 %v2817_v5  ;;  %899 = vmatpush1.bf16.msra.mxu1 %v2819_v2  ;;  %v2806_v58 = vcombine.high %v3851_v34, %v3861_v36  ;;  %v2811_v8 = vcombine.low %v3876_v39, %v3886_v41  ;;  %v2808_v10 = vcombine.high %v3856_v35, %v3866_v37  ;;  %p683_p0 = scmp.ge.s32.totalorder %s686_s26, 8  }
 0x1f9   : > { %859 = vmatprep.subr.bf16.mxu0 %v2814_v0  ;;  %900 = vmatprep.subr.bf16.mxu1 %v2816_v15  ;;  %v2805_v12 = vcombine.low %v3851_v34, %v3861_v36  ;;  %v2802_v6 = vcombine.high %v3831_v30, %v3841_v32  ;;  %v2807_v9 = vcombine.low %v3856_v35, %v3866_v37  ;;  %v4313_v34 = vld [vmem:[%s5106_s5 + $0x190] sm:$0xff] (%p683_p0)  ;;  %v4318_v35 = vld [vmem:[%s5106_s5 + $0x198] sm:$0xff] (%p683_p0)  ;;  %v4323_v36 = vld [vmem:[%s5106_s5 + $0x1a0] sm:$0xff] (%p683_p0)  ;;  %s4533_s0 = smov (%p683_p0), 0  }
 0x1fa   : > { %889 = vmatprep.mubr.bf16.mxu0 %v3652_v19  ;;  %930 = vmatprep.mubr.bf16.mxu1 %v3652_v19  ;;  %v2804_v63 = vcombine.high %v3836_v31, %v3846_v33  ;;  %v2801_v11 = vcombine.low %v3831_v30, %v3841_v32  ;;  %v2798_v3 = vcombine.high %v3811_v26, %v3821_v28  ;;  %v4293_v30 = vld [vmem:[%s5106_s5 + $0x170] sm:$0xff] (%p683_p0)  ;;  %v4303_v32 = vld [vmem:[%s5106_s5 + $0x180] sm:$0xff] (%p683_p0)  ;;  %v4328_v37 = vld [vmem:[%s5106_s5 + $0x1a8] sm:$0xff] (%p683_p0) }
 0x1fb   : > { %v2803_v16 = vcombine.low %v3836_v31, %v3846_v33  ;;  %v2800_v52 = vcombine.high %v3816_v27, %v3826_v29  ;;  %v2797_v56 = vcombine.low %v3811_v26, %v3821_v28  ;;  %v2794_v50 = vcombine.high %v3790_v22, %v3801_v24  ;;  %v693_v19 = vld [vmem:[%s691_s28 + $0x8] sm:$0xff]  ;;  %v4273_v26 = vld [vmem:[%s5106_s5 + $0x150] sm:$0xff] (%p683_p0)  ;;  %v4283_v28 = vld [vmem:[%s5106_s5 + $0x160] sm:$0xff] (%p683_p0) }
 0x1fc   : > { %860 = vmatpush1.bf16.msra.mxu0 %v2813_v13  ;;  %901 = vmatpush1.bf16.msra.mxu1 %v2815_v14  ;;  %v2799_v57 = vcombine.low %v3816_v27, %v3826_v29  ;;  %v2796_v53 = vcombine.high %v3795_v23, %v3806_v25  ;;  %v2793_v1 = vcombine.low %v3790_v22, %v3801_v24  ;;  %v692_v14 = vld [vmem:[%s691_s28] sm:$0xff]  ;;  %v4253_v22 = vld [vmem:[%s5106_s5 + $0x130] sm:$0xff] (%p683_p0)  ;;  %v4278_v27 = vld [vmem:[%s5106_s5 + $0x158] sm:$0xff] (%p683_p0) }
 0x1fd   : > { %861 = vmatprep.subr.bf16.mxu0 %v2810_v7  ;;  %902 = vmatprep.subr.bf16.mxu1 %v2812_v17  ;;  %v2790_v5 = vcombine.high %v3769_v18, %v3779_v20  ;;  %v2795_v0 = vcombine.low %v3795_v23, %v3806_v25  ;;  %v2792_v2 = vcombine.high %v5117_v4, %v3785_v21  ;;  %v4258_v23 = vld [vmem:[%s5106_s5 + $0x138] sm:$0xff] (%p683_p0)  ;;  %v4263_v24 = vld [vmem:[%s5106_s5 + $0x140] sm:$0xff] (%p683_p0)  ;;  %v4268_v25 = vld [vmem:[%s5106_s5 + $0x148] sm:$0xff] (%p683_p0) }
 0x1fe   : > { %v2789_v15 = vcombine.low %v3769_v18, %v3779_v20  ;;  %v2791_v13 = vcombine.low %v5117_v4, %v3785_v21  ;;  %v696_v7 = vpack.c.bf16 %v3621_v62, %v3621_v62  ;;  %v4238_v18 = vld [vmem:[%s5106_s5 + $0x118] sm:$0xff] (%p683_p0)  ;;  %v4243_v20 = vld [vmem:[%s5106_s5 + $0x120] sm:$0xff] (%p683_p0)  ;;  %v4248_v21 = vld [vmem:[%s5106_s5 + $0x128] sm:$0xff] (%p683_p0) }
 0x1ff   :  { %v4288_v29 = vld [vmem:[%s5106_s5 + $0x168] sm:$0xff] (%p683_p0)  ;;  %v4298_v31 = vld [vmem:[%s5106_s5 + $0x178] sm:$0xff] (%p683_p0)  ;;  %v4333_v38 = vld [vmem:[%s5106_s5 + $0x1b0] sm:$0xff] (%p683_p0) }
 0x200   : > { %862 = vmatpush1.bf16.msra.mxu0 %v2809_v51  ;;  %903 = vmatpush1.bf16.msra.mxu1 %v2811_v8  ;;  %v4308_v33 = vld [vmem:[%s5106_s5 + $0x188] sm:$0xff] (%p683_p0)  ;;  %v4338_v39 = vld [vmem:[%s5106_s5 + $0x1b8] sm:$0xff] (%p683_p0)  ;;  %v4343_v40 = vld [vmem:[%s5106_s5 + $0x1c0] sm:$0xff] (%p683_p0) }
 0x201   : > { %863 = vmatprep.subr.bf16.mxu0 %v2806_v58  ;;  %904 = vmatprep.subr.bf16.mxu1 %v2808_v10  ;;  %v4348_v41 = vld [vmem:[%s5106_s5 + $0x1c8] sm:$0xff] (%p683_p0)  ;;  %v4353_v42 = vld [vmem:[%s5106_s5 + $0x1d0] sm:$0xff] (%p683_p0)  ;;  %v4358_v43 = vld [vmem:[%s5106_s5 + $0x1d8] sm:$0xff] (%p683_p0) }
 0x202   :  { %v4363_v44 = vld [vmem:[%s5106_s5 + $0x1e0] sm:$0xff] (%p683_p0)  ;;  %v4368_v45 = vld [vmem:[%s5106_s5 + $0x1e8] sm:$0xff] (%p683_p0)  ;;  %v4373_v46 = vld [vmem:[%s5106_s5 + $0x1f0] sm:$0xff] (%p683_p0) }
 0x203   :  { %v4378_v47 = vld [vmem:[%s5106_s5 + $0x1f8] sm:$0xff] (%p683_p0)  ;;  %v3433_v48 = vld [vmem:[%s5105_s4 + $0x1e4] ss:$16 sps:$4 sm:$0xff] (%p683_p0)  }
 0x204   : > { %864 = vmatpush1.bf16.msra.mxu0 %v2805_v12  ;;  %905 = vmatpush1.bf16.msra.mxu1 %v2807_v9  ;;  %v3435_v49 = vld [vmem:[%s5105_s4 + $0x1ec] ss:$16 sps:$4 sm:$0xff] (%p683_p0)   ;;  %v3438_v4 = vld [vmem:[%s5105_s4 + $0x1e8] ss:$16 sps:$4 sm:$0xff] (%p683_p0)  }
 0x205   : > { %865 = vmatprep.subr.bf16.mxu0 %v2802_v6  ;;  %906 = vmatprep.subr.bf16.mxu1 %v2804_v63 }
 0x208   : > { %866 = vmatpush1.bf16.msra.mxu0 %v2801_v11  ;;  %907 = vmatpush1.bf16.msra.mxu1 %v2803_v16  ;;  %v695_v16 = vld [vmem:[%s691_s28 + $0x18] sm:$0xff] }
 0x209   : > { %867 = vmatprep.subr.bf16.mxu0 %v2798_v3  ;;  %908 = vmatprep.subr.bf16.mxu1 %v2800_v52  ;;  %v694_v52 = vld [vmem:[%s691_s28 + $0x10] sm:$0xff] }
 0x20c   : > { %868 = vmatpush1.bf16.msra.mxu0 %v2797_v56  ;;  %909 = vmatpush1.bf16.msra.mxu1 %v2799_v57 }
 0x20d   : > { %869 = vmatprep.subr.bf16.mxu0 %v2794_v50  ;;  %910 = vmatprep.subr.bf16.mxu1 %v2796_v53 }
 0x210   : > { %870 = vmatpush1.bf16.msra.mxu0 %v2793_v1  ;;  %911 = vmatpush1.bf16.msra.mxu1 %v2795_v0 }
 0x211   : > { %871 = vmatprep.subr.bf16.mxu0 %v2790_v5  ;;  %912 = vmatprep.subr.bf16.mxu1 %v2792_v2 }
 0x214   : > { %872 = vmatpush1.bf16.msra.mxu0 %v2789_v15  ;;  %913 = vmatpush1.bf16.msra.mxu1 %v2791_v13 }
 0x215   :  { %1252 = vmatprep.subr.bf16.mxu0 (%p683_p0), %v3433_v48  ;;  %1325 = vmatprep.subr.bf16.mxu1 (%p683_p0), %v3435_v49  ;;  %v3474_v48 = vld [vmem:[%s5105_s4 + $0x128] ss:$16 sps:$4 sm:$0xff] (%p683_p0)   ;;  %v3475_v49 = vld [vmem:[%s5105_s4 + $0x104] ss:$16 sps:$4 sm:$0xff] (%p683_p0)  }
 0x217   : > { %890 = vmatmul.mubr.bf16.vlgmr.msra.gmra.mxu0 %v696_v7  ;;  %931 = vmatmul.mubr.bf16.vlgmr.msra.gmra.mxu1 %v696_v7 }
 0x218   :  { %1326 = vmatpush1.bf16.msra.mxu1 (%p683_p0), %v3438_v4  ;;  %v3479_v4 = vld [vmem:[%s5105_s4 + $0x100] ss:$16 sps:$4 sm:$0xff] (%p683_p0)  }
 0x2d7   : > { %v891_v17 = vpop.f32.mrf.mxu0  ;;  %v932_v58 = vpop.f32.mrf.mxu1 }
 0x2d8   : > { %v939_v51 = vadd.f32 %v891_v17, %v692_v14  ;;  %v941_v50 = vadd.f32 %v932_v58, %v694_v52  ;;  %v3447_v52 = vld [vmem:[%s5105_s4 + $0x1ac] ss:$16 sps:$4 sm:$0xff] (%p683_p0)  }
 0x2d9   : > { %v893_v8 = vpop.f32.mrf.mxu0  ;;  %v934_v6 = vpop.f32.mrf.mxu1 }
 0x2da   : > { %v2821_v10 = vmul.f32 -1.442695, %v939_v51  ;;  %v940_v12 = vadd.f32 %v893_v8, %v693_v19  ;;  %v942_v56 = vadd.f32 %v934_v6, %v695_v16  ;;  %v4231_v6 = vld [vmem:[%s5106_s5 + $0x110] sm:$0xff] (%p683_p0) }
 0x2db   : > { %v895_v9 = vpop.f32.mrf.mxu0  ;;  %v936_v11 = vpop.f32.mrf.mxu1  ;;  %v3445_v16 = vld [vmem:[%s5105_s4 + $0x1a4] ss:$16 sps:$4 sm:$0xff] (%p683_p0)  }
 0x2dc   : > { %3417 = vpow2.f32 %v2821_v10  ;;  %v2822_v63 = vmul.f32 -1.442695, %v940_v12  ;;  %v2823_v57 = vmul.f32 -1.442695, %v942_v56  ;;  %v4221_v10 = vld [vmem:[%s5106_s5 + $0x100] sm:$0xff] (%p683_p0)  ;;  %v4226_v12 = vld [vmem:[%s5106_s5 + $0x108] sm:$0xff] (%p683_p0) }
 0x2dd   : > { %v896_v62 = vpop.f32.mrf.mxu0  ;;  %v937_v3 = vpop.f32.mrf.mxu1  ;;  %v5118_v9 = vmov (%p683_p0), 0   ;;  %v3441_v11 = vld [vmem:[%s5105_s4 + $0x1cc] ss:$16 sps:$4 sm:$0xff] (%p683_p0)   ;;  %v3449_v56 = vld [vmem:[%s5105_s4 + $0x1a0] ss:$16 sps:$4 sm:$0xff] (%p683_p0)  }
 0x2de   : > { %3419 = vpow2.f32 %v2822_v63  ;;  %1284 = vmatprep.mubr.bf16.mxu0 (%p683_p0), %v5118_v9  ;;  %1357 = vmatprep.mubr.bf16.mxu1 (%p683_p0), %v5118_v9  ;;  %v3439_v63 = vld [vmem:[%s5105_s4 + $0x1c4] ss:$16 sps:$4 sm:$0xff] (%p683_p0)   ;;  %v3444_v3 = vld [vmem:[%s5105_s4 + $0x1c8] ss:$16 sps:$4 sm:$0xff] (%p683_p0)  }
 0x2df   : > { %3421 = vtanh.f32 %v941_v50  ;;  %1327 = vmatprep.subr.bf16.mxu1 (%p683_p0), %v3441_v11  ;;  %v3450_v50 = vld [vmem:[%s5105_s4 + $0x1a8] ss:$16 sps:$4 sm:$0xff] (%p683_p0)  }
 0x2e0   : > { %3423 = vpow2.f32 %v2823_v57  ;;  %1328 = vmatpush1.bf16.msra.mxu1 (%p683_p0), %v3444_v3  ;;  %v3451_v57 = vld [vmem:[%s5105_s4 + $0x184] ss:$16 sps:$4 sm:$0xff] (%p683_p0)  }
 0x2e1   :  { %1329 = vmatprep.subr.bf16.mxu1 (%p683_p0), %v3447_v52  ;;  %v2889_v52 = vld [vmem:[%s5108_s6 + $0x4] sm:$0xf] (%p683_p0) }
 0x2e4   :  { %1330 = vmatpush1.bf16.msra.mxu1 (%p683_p0), %v3450_v50  ;;  %v4489_v50 = vrot.slane (%p683_p0), %v2889_v52, %v4074_v55 }
 0x2e9   : > { %v3418_v53 = vpop.eup %3417 }
 0x2ea   : > { %v946_v1 = vadd.f32 1.0, %v3418_v53  ;;  %v3453_v53 = vld [vmem:[%s5105_s4 + $0x18c] ss:$16 sps:$4 sm:$0xff] (%p683_p0)  }
 0x2eb   : > { %v3420_v5 = vpop.eup %3419  ;;  %1331 = vmatprep.subr.bf16.mxu1 (%p683_p0), %v3453_v53 }
 0x2ec   : > { %3425 = vrcp.f32 %v946_v1  ;;  %v952_v0 = vadd.f32 1.0, %v3420_v5  ;;  %v3422_v2 = vpop.eup %3421  ;;  %v3455_v1 = vld [vmem:[%s5105_s4 + $0x180] ss:$16 sps:$4 sm:$0xff] (%p683_p0)   ;;  %v3456_v5 = vld [vmem:[%s5105_s4 + $0x188] ss:$16 sps:$4 sm:$0xff] (%p683_p0)  }
 0x2ed   : > { %v3424_v15 = vpop.eup %3423  ;;  %1332 = vmatpush1.bf16.msra.mxu1 (%p683_p0), %v3456_v5 }
 0x2ee   : > { %3427 = vrcp.f32 %v952_v0  ;;  %v959_v14 = vadd.f32 1.0, %v3424_v15  ;;  %v3457_v0 = vld [vmem:[%s5105_s4 + $0x164] ss:$16 sps:$4 sm:$0xff] (%p683_p0)   ;;  %v3461_v15 = vld [vmem:[%s5105_s4 + $0x160] ss:$16 sps:$4 sm:$0xff] (%p683_p0)  }
 0x2f0   : > { %3429 = vrcp.f32 %v959_v14  ;;  %v3465_v14 = vld [vmem:[%s5105_s4 + $0x14c] ss:$16 sps:$4 sm:$0xff] (%p683_p0)  }
 0x2f9   : > { %v3426_v13 = vpop.eup %3425 }
 0x2fa   : > { %v963_v19 = vmul.f32 %v3426_v13, %v3422_v2  ;;  %v3459_v2 = vld [vmem:[%s5105_s4 + $0x16c] ss:$16 sps:$4 sm:$0xff] (%p683_p0)   ;;  %v3462_v13 = vld [vmem:[%s5105_s4 + $0x168] ss:$16 sps:$4 sm:$0xff] (%p683_p0)  }
 0x2fb   : > { %v3428_v7 = vpop.eup %3427  ;;  %1333 = vmatprep.subr.bf16.mxu1 (%p683_p0), %v3459_v2 }
 0x2fc   : > { %v962_v17 = vmul.f32 %v3617_v60, %v3428_v7  ;;  %v3463_v7 = vld [vmem:[%s5105_s4 + $0x144] ss:$16 sps:$4 sm:$0xff] (%p683_p0)   ;;  %1334 = vmatpush1.bf16.msra.mxu1 (%p683_p0), %v3462_v13 }
 0x2fd   : > { %v3430_v51 = vpop.eup %3429  ;;  %1335 = vmatprep.subr.bf16.mxu1 (%p683_p0), %v3465_v14 }
 0x2fe   : > { %v964_v60 = vadd.f32 %v963_v19, %v962_v17   ;;  %v3467_v17 = vld [vmem:[%s5105_s4 + $0x140] ss:$16 sps:$4 sm:$0xff] (%p683_p0)   ;;  %v3468_v19 = vld [vmem:[%s5105_s4 + $0x148] ss:$16 sps:$4 sm:$0xff] (%p683_p0)  }
 0x300   : > { %3431 = vtanh.f32 %v964_v60  ;;  %v3437_v60 = vld [vmem:[%s5105_s4 + $0x1e0] ss:$16 sps:$4 sm:$0xff] (%p683_p0)   ;;  %1336 = vmatpush1.bf16.msra.mxu1 (%p683_p0), %v3468_v19 }
 0x301   :  { %1253 = vmatpush1.bf16.msra.mxu0 (%p683_p0), %v3437_v60  ;;  %v3477_v60 = vld [vmem:[%s5105_s4 + $0x10c] ss:$16 sps:$4 sm:$0xff] (%p683_p0)  }
 0x302   :  { %1254 = vmatprep.subr.bf16.mxu0 (%p683_p0), %v3439_v63  ;;  %v3480_v63 = vld [vmem:[%s5105_s4 + $0x108] ss:$16 sps:$4 sm:$0xff] (%p683_p0)  }
 0x30d   : > { %v3432_v58 = vpop.eup %3431 }
 0x30e   : > { %v966_v62 = vmul.f32 %v3432_v58, %v3430_v51   ;;  %685 = sbr.rel (!%p683_p0) target bundleno = 501 (0x1f5), region = 89  ;;  %v3469_v51 = vld [vmem:[%s5105_s4 + $0x124] ss:$16 sps:$4 sm:$0xff] (%p683_p0)   ;;  %v3471_v58 = vld [vmem:[%s5105_s4 + $0x12c] ss:$16 sps:$4 sm:$0xff] (%p683_p0)  }
 0x30f   :  { %1337 = vmatprep.subr.bf16.mxu1 (%p683_p0), %v3471_v58 }
 0x310   : > { %v967_v8 = vpack.c.bf16 %v966_v62, %v966_v62  ;;  %v3443_v62 = vld [vmem:[%s5105_s4 + $0x1c0] ss:$16 sps:$4 sm:$0xff] (%p683_p0)   ;;  %1338 = vmatpush1.bf16.msra.mxu1 (%p683_p0), %v3474_v48 }
 0x311   :  { %1255 = vmatpush1.bf16.msra.mxu0 (%p683_p0), %v3443_v62  ;;  %1339 = vmatprep.subr.bf16.mxu1 (%p683_p0), %v3477_v60 }
 0x312   : > { %970 = vst [vmem:[%s969_s30] sm:$0xf] %v967_v8  ;;  %1256 = vmatprep.subr.bf16.mxu0 (%p683_p0), %v3445_v16  ;;  %v3473_v8 = vld [vmem:[%s5105_s4 + $0x120] ss:$16 sps:$4 sm:$0xff] (%p683_p0)  }
 0x314   :  { %1340 = vmatpush1.bf16.msra.mxu1 %v3480_v63 }
 0x315   :  { %1257 = vmatpush1.bf16.msra.mxu0 %v3449_v56  ;;  %v4486_v56 = vrot.slane %v2889_v52, %v4072_v54 }
 0x316   :  { %1258 = vmatprep.subr.bf16.mxu0 %v3451_v57  ;;  %v4492_v57 = vrot.slane %v2889_v52, %v4079_v59 }
 0x319   :  { %1259 = vmatpush1.bf16.msra.mxu0 %v3455_v1  ;;  %v3481_v11 = vld [vmem:[#allocation2] sm:$0xff]   ;;  %v3482_v62 = vld [vmem:[#allocation2 + $0x8] sm:$0xff]   ;;  %v3483_v3 = vld [vmem:[#allocation2 + $0x10] sm:$0xff]   ;;  %v4495_v1 = vrot.slane %v2889_v52, %v4081_v61 }
 0x31a   :  { %1260 = vmatprep.subr.bf16.mxu0 %v3457_v0  ;;  %1358 = vmatmul.mubr.bf16.vlgmr.msra.gmra.mxu1 %v3481_v11  ;;  %v3484_v16 = vld [vmem:[#allocation2 + $0x18] sm:$0xff]  }
 0x31b   :  { %1367 = vmatprep.mubr.bf16.mxu1 %v5118_v9 }
 0x31d   :  { %1261 = vmatpush1.bf16.msra.mxu0 %v3461_v15 }
 0x31e   :  { %1262 = vmatprep.subr.bf16.mxu0 %v3463_v7 }
 0x321   :  { %1263 = vmatpush1.bf16.msra.mxu0 %v3467_v17 }
 0x322   :  { %1264 = vmatprep.subr.bf16.mxu0 %v3469_v51  ;;  %1368 = vmatmul.mubr.bf16.gmra.mxu1 %v3482_v62 }
 0x323   :  { %1377 = vmatprep.mubr.bf16.mxu1 %v5118_v9 }
 0x325   :  { %1265 = vmatpush1.bf16.msra.mxu0 %v3473_v8 }
 0x326   :  { %1266 = vmatprep.subr.bf16.mxu0 %v3475_v49 }
 0x329   :  { %1267 = vmatpush1.bf16.msra.mxu0 %v3479_v4 }
 0x32a   :  { %1378 = vmatmul.mubr.bf16.gmra.mxu1 %v3483_v3 }
 0x32b   :  { %1387 = vmatprep.mubr.bf16.mxu1 %v5118_v9 }
 0x32c   :  { %1285 = vmatmul.mubr.bf16.vlgmr.msra.gmra.mxu0 %v3481_v11 }
 0x32d   :  { %1294 = vmatprep.mubr.bf16.mxu0 %v5118_v9 }
 0x332   :  { %1388 = vmatmul.mubr.bf16.gmra.mxu1 %v3484_v16 }
 0x334   :  { %1295 = vmatmul.mubr.bf16.gmra.mxu0 %v3482_v62 }
 0x335   :  { %1304 = vmatprep.mubr.bf16.mxu0 %v5118_v9 }
 0x33c   :  { %1305 = vmatmul.mubr.bf16.gmra.mxu0 %v3483_v3 }
 0x33d   :  { %1314 = vmatprep.mubr.bf16.mxu0 %v5118_v9 }
 0x344   :  { %1315 = vmatmul.mubr.bf16.gmra.mxu0 %v3484_v16 }
 0x3da   :  { %v1359_v5 = vpop.f32.mrf.mxu1 }
 0x3db   :  { %v1360_v0 = vadd.f32 %v1359_v5, %v4489_v50 }
 0x3dc   :  { %v1361_v13 = vpop.f32.mrf.mxu1 }
 0x3dd   :  { %1400 = vst [vmem:[#allocation3 + $0x10] sm:$0xff] %v1360_v0  ;;  %v1362_v7 = vadd.f32 %v1361_v13, %v4495_v1 }
 0x3de   :  { %v1363_v19 = vpop.f32.mrf.mxu1 }
 0x3df   :  { %1401 = vst [vmem:[#allocation3 + $0x18] sm:$0xff] %v1362_v7  ;;  %v1364_v51 = vadd.f32 %v1363_v19, %v4489_v50 }
 0x3e0   :  { %v1365_v48 = vpop.f32.mrf.mxu1 }
 0x3e1   :  { %1404 = vst [vmem:[#allocation3 + $0x30] sm:$0xff] %v1364_v51  ;;  %v1366_v49 = vadd.f32 %v1365_v48, %v4495_v1 }
 0x3e2   :  { %v1369_v63 = vpop.f32.mrf.mxu1 }
 0x3e3   :  { %1405 = vst [vmem:[#allocation3 + $0x38] sm:$0xff] %v1366_v49  ;;  %v1370_v11 = vadd.f32 %v1369_v63, %v4489_v50 }
 0x3e4   :  { %v1371_v16 = vpop.f32.mrf.mxu1 }
 0x3e5   :  { %1408 = vst [vmem:[#allocation3 + $0x50] sm:$0xff] %v1370_v11  ;;  %v1372_v52 = vadd.f32 %v1371_v16, %v4495_v1 }
 0x3e6   :  { %v1373_v5 = vpop.f32.mrf.mxu1 }
 0x3e7   :  { %1409 = vst [vmem:[#allocation3 + $0x58] sm:$0xff] %v1372_v52  ;;  %v1374_v0 = vadd.f32 %v1373_v5, %v4489_v50 }
 0x3e8   :  { %v1375_v13 = vpop.f32.mrf.mxu1 }
 0x3e9   :  { %1412 = vst [vmem:[#allocation3 + $0x70] sm:$0xff] %v1374_v0  ;;  %v1376_v7 = vadd.f32 %v1375_v13, %v4495_v1 }
 0x3ea   :  { %v1379_v19 = vpop.f32.mrf.mxu1 }
 0x3eb   :  { %1413 = vst [vmem:[#allocation3 + $0x78] sm:$0xff] %v1376_v7  ;;  %v1380_v51 = vadd.f32 %v1379_v19, %v4489_v50 }
 0x3ec   :  { %v1286_v53 = vpop.f32.mrf.mxu0  ;;  %v1381_v48 = vpop.f32.mrf.mxu1 }
 0x3ed   :  { %v1287_v9 = vadd.f32 %v1286_v53, %v4486_v56  ;;  %1416 = vst [vmem:[#allocation3 + $0x90] sm:$0xff] %v1380_v51  ;;  %v1382_v49 = vadd.f32 %v1381_v48, %v4495_v1 }
 0x3ee   :  { %v1288_v2 = vpop.f32.mrf.mxu0  ;;  %v1383_v63 = vpop.f32.mrf.mxu1 }
 0x3ef   :  { %1398 = vst [vmem:[#allocation3] sm:$0xff] %v1287_v9  ;;  %v1289_v15 = vadd.f32 %v1288_v2, %v4492_v57  ;;  %1417 = vst [vmem:[#allocation3 + $0x98] sm:$0xff] %v1382_v49  ;;  %v1384_v11 = vadd.f32 %v1383_v63, %v4489_v50 }
 0x3f0   :  { %v1290_v14 = vpop.f32.mrf.mxu0  ;;  %v1385_v16 = vpop.f32.mrf.mxu1 }
 0x3f1   :  { %1399 = vst [vmem:[#allocation3 + $0x8] sm:$0xff] %v1289_v15  ;;  %v1291_v17 = vadd.f32 %v1290_v14, %v4486_v56  ;;  %1420 = vst [vmem:[#allocation3 + $0xb0] sm:$0xff] %v1384_v11  ;;  %v1386_v52 = vadd.f32 %v1385_v16, %v4495_v1 }
 0x3f2   :  { %v1292_v58 = vpop.f32.mrf.mxu0  ;;  %v1389_v5 = vpop.f32.mrf.mxu1 }
 0x3f3   :  { %1402 = vst [vmem:[#allocation3 + $0x20] sm:$0xff] %v1291_v17  ;;  %v1293_v8 = vadd.f32 %v1292_v58, %v4492_v57  ;;  %1421 = vst [vmem:[#allocation3 + $0xb8] sm:$0xff] %v1386_v52  ;;  %v1390_v0 = vadd.f32 %v1389_v5, %v4489_v50 }
 0x3f4   :  { %v1296_v60 = vpop.f32.mrf.mxu0  ;;  %v1391_v13 = vpop.f32.mrf.mxu1 }
 0x3f5   :  { %1403 = vst [vmem:[#allocation3 + $0x28] sm:$0xff] %v1293_v8  ;;  %v1297_v4 = vadd.f32 %v1296_v60, %v4486_v56  ;;  %1424 = vst [vmem:[#allocation3 + $0xd0] sm:$0xff] %v1390_v0  ;;  %v1392_v7 = vadd.f32 %v1391_v13, %v4495_v1 }
 0x3f6   :  { %v1298_v62 = vpop.f32.mrf.mxu0  ;;  %v1393_v19 = vpop.f32.mrf.mxu1 }
 0x3f7   :  { %1406 = vst [vmem:[#allocation3 + $0x40] sm:$0xff] %v1297_v4  ;;  %v1299_v3 = vadd.f32 %v1298_v62, %v4492_v57  ;;  %1425 = vst [vmem:[#allocation3 + $0xd8] sm:$0xff] %v1392_v7  ;;  %v1394_v51 = vadd.f32 %v1393_v19, %v4489_v50 }
 0x3f8   :  { %v1300_v53 = vpop.f32.mrf.mxu0  ;;  %v1395_v48 = vpop.f32.mrf.mxu1 }
 0x3f9   :  { %1407 = vst [vmem:[#allocation3 + $0x48] sm:$0xff] %v1299_v3  ;;  %v1301_v9 = vadd.f32 %v1300_v53, %v4486_v56  ;;  %1428 = vst [vmem:[#allocation3 + $0xf0] sm:$0xff] %v1394_v51  ;;  %v1396_v49 = vadd.f32 %v1395_v48, %v4495_v1 }
 0x3fa   :  { %v1302_v2 = vpop.f32.mrf.mxu0 }
 0x3fb   :  { %1410 = vst [vmem:[#allocation3 + $0x60] sm:$0xff] %v1301_v9  ;;  %v1303_v15 = vadd.f32 %v1302_v2, %v4492_v57  ;;  %1429 = vst [vmem:[#allocation3 + $0xf8] sm:$0xff] %v1396_v49 }
 0x3fc   :  { %v1306_v14 = vpop.f32.mrf.mxu0 }
 0x3fd   :  { %1411 = vst [vmem:[#allocation3 + $0x68] sm:$0xff] %v1303_v15  ;;  %v1307_v17 = vadd.f32 %v1306_v14, %v4486_v56 }
 0x3fe   :  { %v1308_v58 = vpop.f32.mrf.mxu0 }
 0x3ff   :  { %1414 = vst [vmem:[#allocation3 + $0x80] sm:$0xff] %v1307_v17  ;;  %v1309_v8 = vadd.f32 %v1308_v58, %v4492_v57 }
 0x400   :  { %v1310_v60 = vpop.f32.mrf.mxu0 }
 0x401   :  { %1415 = vst [vmem:[#allocation3 + $0x88] sm:$0xff] %v1309_v8  ;;  %v1311_v4 = vadd.f32 %v1310_v60, %v4486_v56  ;;  %v4529_v60 = vmov 0.0  }
 0x402   :  { %v1312_v62 = vpop.f32.mrf.mxu0 }
 0x403   :  { %1418 = vst [vmem:[#allocation3 + $0xa0] sm:$0xff] %v1311_v4  ;;  %v1313_v3 = vadd.f32 %v1312_v62, %v4492_v57  ;;  %v4531_v4 = vmov 0.0  }
 0x404   :  { %v1316_v53 = vpop.f32.mrf.mxu0 }
 0x405   :  { %1419 = vst [vmem:[#allocation3 + $0xa8] sm:$0xff] %v1313_v3  ;;  %v1317_v9 = vadd.f32 %v1316_v53, %v4486_v56 }
 0x406   :  { %v1318_v2 = vpop.f32.mrf.mxu0 }
 0x407   :  { %1422 = vst [vmem:[#allocation3 + $0xc0] sm:$0xff] %v1317_v9  ;;  %v1319_v15 = vadd.f32 %v1318_v2, %v4492_v57 }
 0x408   :  { %v1320_v14 = vpop.f32.mrf.mxu0 }
 0x409   :  { %1423 = vst [vmem:[#allocation3 + $0xc8] sm:$0xff] %v1319_v15  ;;  %v1321_v17 = vadd.f32 %v1320_v14, %v4486_v56 }
 0x40a   :  { %v1322_v58 = vpop.f32.mrf.mxu0 }
 0x40b   :  { %1426 = vst [vmem:[#allocation3 + $0xe0] sm:$0xff] %v1321_v17  ;;  %v1323_v8 = vadd.f32 %v1322_v58, %v4492_v57 }
 0x40d   :  { %1427 = vst [vmem:[#allocation3 + $0xe8] sm:$0xff] %v1323_v8 }
 0x40e LB: > { %v2957_v56 = vcombine.high %v4363_v44, %v4373_v46  ;;  %v2956_v50 = vcombine.low %v4363_v44, %v4373_v46  ;;  %v2953_v57 = vcombine.high %v4343_v40, %v4353_v42  ;;  %v2959_v1 = vcombine.high %v4368_v45, %v4378_v47  ;;  %s3113_s19 = sshll.u32 %s3637_s0, 5  ;;  %s2963_s21 = sshll.u32 %s3637_s0, 2  ;;  %s3637_s0 = sphi %s4533_s0, %s1435_s0   ;;  %v3633_v4 = vphi %v4531_v4, %v1715_v4   ;;  %v3629_v60 = vphi %v4529_v60, %v1713_v60  }
 0x40f   : > { %v2958_v63 = vcombine.low %v4368_v45, %v4378_v47  ;;  %v2955_v11 = vcombine.high %v4348_v41, %v4358_v43  ;;  %v2952_v62 = vcombine.low %v4343_v40, %v4353_v42  ;;  %v2949_v3 = vcombine.high %v4323_v36, %v4333_v38  ;;  %s1440_s20 = scalar_lea.vmem [#allocation3], %s3113_s19  ;;  %s1718_s22 = scalar_lea.vmem [#allocation2], %s2963_s21 }
 0x410   : > { %1606 = vmatprep.subr.bf16.mxu0 %v2957_v56  ;;  %1647 = vmatprep.subr.bf16.mxu1 %v2959_v1  ;;  %v2954_v16 = vcombine.low %v4348_v41, %v4358_v43  ;;  %v2951_v52 = vcombine.high %v4328_v37, %v4338_v39  ;;  %v3653_v53 = vmov 0   ;;  %v2948_v9 = vcombine.low %v4323_v36, %v4333_v38  ;;  %s1435_s0 = sadd.s32 1, %s3637_s0  }
 0x411   : > { %1607 = vmatpush1.bf16.msra.mxu0 %v2956_v50  ;;  %1648 = vmatpush1.bf16.msra.mxu1 %v2958_v63  ;;  %v2945_v5 = vcombine.high %v4303_v32, %v4313_v34  ;;  %v2950_v0 = vcombine.low %v4328_v37, %v4338_v39  ;;  %v2947_v2 = vcombine.high %v4308_v33, %v4318_v35  ;;  %p1432_p1 = scmp.ge.s32.totalorder %s1435_s0, 8  }
 0x412   : > { %1608 = vmatprep.subr.bf16.mxu0 %v2953_v57  ;;  %1649 = vmatprep.subr.bf16.mxu1 %v2955_v11  ;;  %v2944_v15 = vcombine.low %v4303_v32, %v4313_v34  ;;  %v2941_v13 = vcombine.high %v4283_v28, %v4293_v30  ;;  %v2946_v7 = vcombine.low %v4308_v33, %v4318_v35  ;;  %v4720_v32 = vld [vmem:[%s5106_s5 + $0x298] sm:$0xff] (%p1432_p1)  ;;  %v4725_v33 = vld [vmem:[%s5106_s5 + $0x2a0] sm:$0xff] (%p1432_p1)  ;;  %v4730_v34 = vld [vmem:[%s5106_s5 + $0x2a8] sm:$0xff] (%p1432_p1) }
 0x413   : > { %1638 = vmatprep.mubr.bf16.mxu0 %v3653_v53  ;;  %1679 = vmatprep.mubr.bf16.mxu1 %v3653_v53  ;;  %v2943_v14 = vcombine.high %v4288_v29, %v4298_v31  ;;  %v2940_v17 = vcombine.low %v4283_v28, %v4293_v30  ;;  %v2937_v19 = vcombine.high %v4263_v24, %v4273_v26  ;;  %v4700_v28 = vld [vmem:[%s5106_s5 + $0x278] sm:$0xff] (%p1432_p1)  ;;  %v4710_v30 = vld [vmem:[%s5106_s5 + $0x288] sm:$0xff] (%p1432_p1)  ;;  %v4735_v35 = vld [vmem:[%s5106_s5 + $0x2b0] sm:$0xff] (%p1432_p1) }
 0x414   : > { %v2942_v51 = vcombine.low %v4288_v29, %v4298_v31  ;;  %v2939_v58 = vcombine.high %v4268_v25, %v4278_v27  ;;  %v2936_v8 = vcombine.low %v4263_v24, %v4273_v26  ;;  %v2933_v48 = vcombine.high %v4243_v20, %v4253_v22  ;;  %v1442_v53 = vld [vmem:[%s1440_s20 + $0x8] sm:$0xff]  ;;  %v4680_v24 = vld [vmem:[%s5106_s5 + $0x258] sm:$0xff] (%p1432_p1)  ;;  %v4705_v29 = vld [vmem:[%s5106_s5 + $0x280] sm:$0xff] (%p1432_p1) }
 0x415   : > { %1609 = vmatpush1.bf16.msra.mxu0 %v2952_v62  ;;  %1650 = vmatpush1.bf16.msra.mxu1 %v2954_v16  ;;  %v2938_v49 = vcombine.low %v4268_v25, %v4278_v27  ;;  %v2935_v56 = vcombine.high %v4248_v21, %v4258_v23  ;;  %v2932_v50 = vcombine.low %v4243_v20, %v4253_v22  ;;  %v1441_v16 = vld [vmem:[%s1440_s20] sm:$0xff]  ;;  %v4660_v20 = vld [vmem:[%s5106_s5 + $0x238] sm:$0xff] (%p1432_p1)  ;;  %v4670_v22 = vld [vmem:[%s5106_s5 + $0x248] sm:$0xff] (%p1432_p1) }
 0x416   : > { %1610 = vmatprep.subr.bf16.mxu0 %v2949_v3  ;;  %1651 = vmatprep.subr.bf16.mxu1 %v2951_v52  ;;  %v2929_v57 = vcombine.high %v4221_v10, %v4231_v6  ;;  %v2934_v1 = vcombine.low %v4248_v21, %v4258_v23  ;;  %v2931_v63 = vcombine.high %v4226_v12, %v4238_v18  ;;  %v4665_v21 = vld [vmem:[%s5106_s5 + $0x240] sm:$0xff] (%p1432_p1)  ;;  %v4675_v23 = vld [vmem:[%s5106_s5 + $0x250] sm:$0xff] (%p1432_p1)  ;;  %v4690_v26 = vld [vmem:[%s5106_s5 + $0x268] sm:$0xff] (%p1432_p1) }
 0x417   : > { %v2928_v11 = vcombine.low %v4221_v10, %v4231_v6  ;;  %v2930_v62 = vcombine.low %v4226_v12, %v4238_v18  ;;  %v1445_v3 = vpack.c.bf16 %v3633_v4, %v3633_v4  ;;  %v4640_v10 = vld [vmem:[%s5106_s5 + $0x218] sm:$0xff] (%p1432_p1)  ;;  %v4645_v12 = vld [vmem:[%s5106_s5 + $0x220] sm:$0xff] (%p1432_p1)  ;;  %v4650_v6 = vld [vmem:[%s5106_s5 + $0x228] sm:$0xff] (%p1432_p1) }
 0x418   :  { %v4655_v18 = vld [vmem:[%s5106_s5 + $0x230] sm:$0xff] (%p1432_p1)  ;;  %v4685_v25 = vld [vmem:[%s5106_s5 + $0x260] sm:$0xff] (%p1432_p1)  ;;  %v4740_v36 = vld [vmem:[%s5106_s5 + $0x2b8] sm:$0xff] (%p1432_p1) }
 0x419   : > { %1611 = vmatpush1.bf16.msra.mxu0 %v2948_v9  ;;  %1652 = vmatpush1.bf16.msra.mxu1 %v2950_v0  ;;  %v4695_v27 = vld [vmem:[%s5106_s5 + $0x270] sm:$0xff] (%p1432_p1)  ;;  %v4745_v37 = vld [vmem:[%s5106_s5 + $0x2c0] sm:$0xff] (%p1432_p1)  ;;  %v4750_v38 = vld [vmem:[%s5106_s5 + $0x2c8] sm:$0xff] (%p1432_p1) }
 0x41a   : > { %1612 = vmatprep.subr.bf16.mxu0 %v2945_v5  ;;  %1653 = vmatprep.subr.bf16.mxu1 %v2947_v2  ;;  %v4715_v31 = vld [vmem:[%s5106_s5 + $0x290] sm:$0xff] (%p1432_p1)  ;;  %v4760_v40 = vld [vmem:[%s5106_s5 + $0x2d8] sm:$0xff] (%p1432_p1)  ;;  %v4765_v41 = vld [vmem:[%s5106_s5 + $0x2e0] sm:$0xff] (%p1432_p1) }
 0x41b   :  { %v4755_v39 = vld [vmem:[%s5106_s5 + $0x2d0] sm:$0xff] (%p1432_p1)  ;;  %v4770_v42 = vld [vmem:[%s5106_s5 + $0x2e8] sm:$0xff] (%p1432_p1)  ;;  %v4780_v44 = vld [vmem:[%s5106_s5 + $0x2f8] sm:$0xff] (%p1432_p1) }
 0x41c   :  { %v4775_v43 = vld [vmem:[%s5106_s5 + $0x2f0] sm:$0xff] (%p1432_p1)  ;;  %v3503_v46 = vld [vmem:[%s5105_s4 + $0x2ec] ss:$16 sps:$4 sm:$0xff] (%p1432_p1)  }
 0x41d   : > { %1613 = vmatpush1.bf16.msra.mxu0 %v2944_v15  ;;  %1654 = vmatpush1.bf16.msra.mxu1 %v2946_v7  ;;  %v3501_v45 = vld [vmem:[%s5105_s4 + $0x2e4] ss:$16 sps:$4 sm:$0xff] (%p1432_p1)   ;;  %v3505_v47 = vld [vmem:[%s5105_s4 + $0x2e0] ss:$16 sps:$4 sm:$0xff] (%p1432_p1)  }
 0x41e   : > { %1614 = vmatprep.subr.bf16.mxu0 %v2941_v13  ;;  %1655 = vmatprep.subr.bf16.mxu1 %v2943_v14 }
 0x421   : > { %1615 = vmatpush1.bf16.msra.mxu0 %v2940_v17  ;;  %1656 = vmatpush1.bf16.msra.mxu1 %v2942_v51  ;;  %v1444_v51 = vld [vmem:[%s1440_s20 + $0x18] sm:$0xff] }
 0x422   : > { %1616 = vmatprep.subr.bf16.mxu0 %v2937_v19  ;;  %1657 = vmatprep.subr.bf16.mxu1 %v2939_v58  ;;  %v1443_v58 = vld [vmem:[%s1440_s20 + $0x10] sm:$0xff] }
 0x425   : > { %1617 = vmatpush1.bf16.msra.mxu0 %v2936_v8  ;;  %1658 = vmatpush1.bf16.msra.mxu1 %v2938_v49 }
 0x426   : > { %1618 = vmatprep.subr.bf16.mxu0 %v2933_v48  ;;  %1659 = vmatprep.subr.bf16.mxu1 %v2935_v56 }
 0x429   : > { %1619 = vmatpush1.bf16.msra.mxu0 %v2932_v50  ;;  %1660 = vmatpush1.bf16.msra.mxu1 %v2934_v1 }
 0x42a   : > { %1620 = vmatprep.subr.bf16.mxu0 %v2929_v57  ;;  %1661 = vmatprep.subr.bf16.mxu1 %v2931_v63 }
 0x42d   : > { %1621 = vmatpush1.bf16.msra.mxu0 %v2928_v11  ;;  %1662 = vmatpush1.bf16.msra.mxu1 %v2930_v62 }
 0x42e   :  { %2001 = vmatprep.subr.bf16.mxu0 (%p1432_p1), %v3501_v45  ;;  %2074 = vmatprep.subr.bf16.mxu1 (%p1432_p1), %v3503_v46  ;;  %v3542_v45 = vld [vmem:[%s5105_s4 + $0x228] ss:$16 sps:$4 sm:$0xff] (%p1432_p1)   ;;  %v3543_v46 = vld [vmem:[%s5105_s4 + $0x204] ss:$16 sps:$4 sm:$0xff] (%p1432_p1)  }
 0x430   : > { %1639 = vmatmul.mubr.bf16.vlgmr.msra.gmra.mxu0 %v1445_v3  ;;  %1680 = vmatmul.mubr.bf16.vlgmr.msra.gmra.mxu1 %v1445_v3 }
 0x431   :  { %2002 = vmatpush1.bf16.msra.mxu0 (%p1432_p1), %v3505_v47  ;;  %v3545_v47 = vld [vmem:[%s5105_s4 + $0x20c] ss:$16 sps:$4 sm:$0xff] (%p1432_p1)  }
 0x4f0   : > { %v1640_v52 = vpop.f32.mrf.mxu0  ;;  %v1681_v5 = vpop.f32.mrf.mxu1 }
 0x4f1   : > { %v1688_v9 = vadd.f32 %v1640_v52, %v1441_v16  ;;  %v1690_v48 = vadd.f32 %v1681_v5, %v1443_v58  ;;  %v3515_v58 = vld [vmem:[%s5105_s4 + $0x2ac] ss:$16 sps:$4 sm:$0xff] (%p1432_p1)  }
 0x4f2   : > { %v1642_v0 = vpop.f32.mrf.mxu0  ;;  %v1683_v13 = vpop.f32.mrf.mxu1 }
 0x4f3   : > { %v2960_v2 = vmul.f32 -1.442695, %v1688_v9  ;;  %v1689_v15 = vadd.f32 %v1642_v0, %v1442_v53  ;;  %v1691_v8 = vadd.f32 %v1683_v13, %v1444_v51  ;;  %v4633_v13 = vld [vmem:[%s5106_s5 + $0x210] sm:$0xff] (%p1432_p1) }
 0x4f4   : > { %v1644_v7 = vpop.f32.mrf.mxu0  ;;  %v1685_v17 = vpop.f32.mrf.mxu1  ;;  %v3513_v51 = vld [vmem:[%s5105_s4 + $0x2a4] ss:$16 sps:$4 sm:$0xff] (%p1432_p1)  }
 0x4f5   : > { %3485 = vpow2.f32 %v2960_v2  ;;  %v2961_v14 = vmul.f32 -1.442695, %v1689_v15  ;;  %v2962_v49 = vmul.f32 -1.442695, %v1691_v8  ;;  %v4623_v2 = vld [vmem:[%s5106_s5 + $0x200] sm:$0xff] (%p1432_p1)  ;;  %v4628_v15 = vld [vmem:[%s5106_s5 + $0x208] sm:$0xff] (%p1432_p1) }
 0x4f6   : > { %v1645_v4 = vpop.f32.mrf.mxu0  ;;  %v1686_v19 = vpop.f32.mrf.mxu1  ;;  %v5119_v7 = vmov (%p1432_p1), 0   ;;  %v3509_v17 = vld [vmem:[%s5105_s4 + $0x2cc] ss:$16 sps:$4 sm:$0xff] (%p1432_p1)   ;;  %v3517_v8 = vld [vmem:[%s5105_s4 + $0x2a0] ss:$16 sps:$4 sm:$0xff] (%p1432_p1)  }
 0x4f7   : > { %3487 = vpow2.f32 %v2961_v14  ;;  %2033 = vmatprep.mubr.bf16.mxu0 (%p1432_p1), %v5119_v7  ;;  %2106 = vmatprep.mubr.bf16.mxu1 (%p1432_p1), %v5119_v7  ;;  %v3507_v14 = vld [vmem:[%s5105_s4 + $0x2c4] ss:$16 sps:$4 sm:$0xff] (%p1432_p1)   ;;  %v3512_v19 = vld [vmem:[%s5105_s4 + $0x2c8] ss:$16 sps:$4 sm:$0xff] (%p1432_p1)  }
 0x4f8   : > { %3489 = vtanh.f32 %v1690_v48  ;;  %2003 = vmatprep.subr.bf16.mxu0 (%p1432_p1), %v3507_v14  ;;  %v3518_v48 = vld [vmem:[%s5105_s4 + $0x2a8] ss:$16 sps:$4 sm:$0xff] (%p1432_p1)  }
 0x4f9   : > { %3491 = vpow2.f32 %v2962_v49  ;;  %v3519_v49 = vld [vmem:[%s5105_s4 + $0x284] ss:$16 sps:$4 sm:$0xff] (%p1432_p1)   ;;  %v3548_v14 = vld [vmem:[%s5105_s4 + $0x208] ss:$16 sps:$4 sm:$0xff] (%p1432_p1)  }
 0x502   : > { %v3486_v56 = vpop.eup %3485 }
 0x503   : > { %v1695_v50 = vadd.f32 1.0, %v3486_v56  ;;  %v3521_v56 = vld [vmem:[%s5105_s4 + $0x28c] ss:$16 sps:$4 sm:$0xff] (%p1432_p1)  }
 0x504   : > { %v3488_v57 = vpop.eup %3487 }
 0x505   : > { %3493 = vrcp.f32 %v1695_v50  ;;  %v1701_v1 = vadd.f32 1.0, %v3488_v57  ;;  %v3490_v63 = vpop.eup %3489  ;;  %v3523_v50 = vld [vmem:[%s5105_s4 + $0x280] ss:$16 sps:$4 sm:$0xff] (%p1432_p1)   ;;  %v3524_v57 = vld [vmem:[%s5105_s4 + $0x288] ss:$16 sps:$4 sm:$0xff] (%p1432_p1)  }
 0x506   : > { %v3492_v11 = vpop.eup %3491 }
 0x507   : > { %3495 = vrcp.f32 %v1701_v1  ;;  %v1708_v16 = vadd.f32 1.0, %v3492_v11  ;;  %v3525_v1 = vld [vmem:[%s5105_s4 + $0x264] ss:$16 sps:$4 sm:$0xff] (%p1432_p1)   ;;  %v3529_v11 = vld [vmem:[%s5105_s4 + $0x260] ss:$16 sps:$4 sm:$0xff] (%p1432_p1)  }
 0x509   : > { %3497 = vrcp.f32 %v1708_v16  ;;  %v3533_v16 = vld [vmem:[%s5105_s4 + $0x24c] ss:$16 sps:$4 sm:$0xff] (%p1432_p1)  }
 0x512   : > { %v3494_v62 = vpop.eup %3493 }
 0x513   : > { %v1712_v53 = vmul.f32 %v3494_v62, %v3490_v63  ;;  %v3527_v63 = vld [vmem:[%s5105_s4 + $0x26c] ss:$16 sps:$4 sm:$0xff] (%p1432_p1)   ;;  %v3530_v62 = vld [vmem:[%s5105_s4 + $0x268] ss:$16 sps:$4 sm:$0xff] (%p1432_p1)  }
 0x514   : > { %v3496_v3 = vpop.eup %3495 }
 0x515   : > { %v1711_v52 = vmul.f32 %v3629_v60, %v3496_v3  ;;  %v3531_v3 = vld [vmem:[%s5105_s4 + $0x244] ss:$16 sps:$4 sm:$0xff] (%p1432_p1)  }
 0x516   : > { %v3498_v9 = vpop.eup %3497 }
 0x517   : > { %v1713_v60 = vadd.f32 %v1712_v53, %v1711_v52   ;;  %v3535_v52 = vld [vmem:[%s5105_s4 + $0x240] ss:$16 sps:$4 sm:$0xff] (%p1432_p1)   ;;  %v3536_v53 = vld [vmem:[%s5105_s4 + $0x248] ss:$16 sps:$4 sm:$0xff] (%p1432_p1)  }
 0x519   : > { %3499 = vtanh.f32 %v1713_v60  ;;  %v3506_v60 = vld [vmem:[%s5105_s4 + $0x2e8] ss:$16 sps:$4 sm:$0xff] (%p1432_p1)  }
 0x51a   :  { %2075 = vmatpush1.bf16.msra.mxu1 (%p1432_p1), %v3506_v60  ;;  %v3547_v60 = vld [vmem:[%s5105_s4 + $0x200] ss:$16 sps:$4 sm:$0xff] (%p1432_p1)  }
 0x51b   :  { %2076 = vmatprep.subr.bf16.mxu1 (%p1432_p1), %v3509_v17 }
 0x51e   :  { %2077 = vmatpush1.bf16.msra.mxu1 (%p1432_p1), %v3512_v19 }
 0x51f   :  { %2078 = vmatprep.subr.bf16.mxu1 (%p1432_p1), %v3515_v58  ;;  %v3028_v58 = vld [vmem:[%s5108_s6 + $0x8] sm:$0xf] (%p1432_p1)  ;;  %s4935_s6 = smov (%p1432_p1), 0  }
 0x522   :  { %2079 = vmatpush1.bf16.msra.mxu1 (%p1432_p1), %v3518_v48  ;;  %v4891_v48 = vrot.slane (%p1432_p1), %v3028_v58, %v4074_v55 }
 0x523   :  { %2080 = vmatprep.subr.bf16.mxu1 (%p1432_p1), %v3521_v56 }
 0x526   : > { %v3500_v5 = vpop.eup %3499  ;;  %2081 = vmatpush1.bf16.msra.mxu1 (%p1432_p1), %v3524_v57 }
 0x527   : > { %v1715_v4 = vmul.f32 %v3500_v5, %v3498_v9   ;;  %1434 = sbr.rel (!%p1432_p1) target bundleno = 1038 (0x40e), region = 100  ;;  %2082 = vmatprep.subr.bf16.mxu1 (%p1432_p1), %v3527_v63  ;;  %v3537_v9 = vld [vmem:[%s5105_s4 + $0x224] ss:$16 sps:$4 sm:$0xff] (%p1432_p1)   ;;  %v3539_v5 = vld [vmem:[%s5105_s4 + $0x22c] ss:$16 sps:$4 sm:$0xff] (%p1432_p1)  }
 0x529   : > { %v1716_v0 = vpack.c.bf16 %v1715_v4, %v1715_v4  ;;  %v3511_v4 = vld [vmem:[%s5105_s4 + $0x2c0] ss:$16 sps:$4 sm:$0xff] (%p1432_p1)  }
 0x52a   :  { %2004 = vmatpush1.bf16.msra.mxu0 (%p1432_p1), %v3511_v4  ;;  %2083 = vmatpush1.bf16.msra.mxu1 (%p1432_p1), %v3530_v62 }
 0x52b   : > { %1719 = vst [vmem:[%s1718_s22] sm:$0xf] %v1716_v0  ;;  %2005 = vmatprep.subr.bf16.mxu0 (%p1432_p1), %v3513_v51  ;;  %2084 = vmatprep.subr.bf16.mxu1 (%p1432_p1), %v3533_v16  ;;  %v3541_v0 = vld [vmem:[%s5105_s4 + $0x220] ss:$16 sps:$4 sm:$0xff] (%p1432_p1)  }
 0x52e   :  { %2006 = vmatpush1.bf16.msra.mxu0 %v3517_v8  ;;  %2085 = vmatpush1.bf16.msra.mxu1 %v3536_v53  ;;  %v4888_v8 = vrot.slane %v3028_v58, %v4072_v54 }
 0x52f   :  { %2007 = vmatprep.subr.bf16.mxu0 %v3519_v49  ;;  %2086 = vmatprep.subr.bf16.mxu1 %v3539_v5  ;;  %v4894_v49 = vrot.slane %v3028_v58, %v4079_v59 }
 0x532   :  { %2008 = vmatpush1.bf16.msra.mxu0 %v3523_v50  ;;  %2087 = vmatpush1.bf16.msra.mxu1 %v3542_v45  ;;  %v3549_v17 = vld [vmem:[#allocation2] sm:$0xff]   ;;  %v3550_v4 = vld [vmem:[#allocation2 + $0x8] sm:$0xff]   ;;  %v3551_v19 = vld [vmem:[#allocation2 + $0x10] sm:$0xff]   ;;  %v4897_v50 = vrot.slane %v3028_v58, %v4081_v61 }
 0x533   :  { %2009 = vmatprep.subr.bf16.mxu0 %v3525_v1  ;;  %2088 = vmatprep.subr.bf16.mxu1 %v3545_v47  ;;  %v3552_v51 = vld [vmem:[#allocation2 + $0x18] sm:$0xff]  }
 0x536   :  { %2010 = vmatpush1.bf16.msra.mxu0 %v3529_v11  ;;  %2089 = vmatpush1.bf16.msra.mxu1 %v3548_v14 }
 0x537   :  { %2011 = vmatprep.subr.bf16.mxu0 %v3531_v3 }
 0x539   :  { %2107 = vmatmul.mubr.bf16.vlgmr.msra.gmra.mxu1 %v3549_v17 }
 0x53a   :  { %2012 = vmatpush1.bf16.msra.mxu0 %v3535_v52  ;;  %2116 = vmatprep.mubr.bf16.mxu1 %v5119_v7 }
 0x53b   :  { %2013 = vmatprep.subr.bf16.mxu0 %v3537_v9 }
 0x53e   :  { %2014 = vmatpush1.bf16.msra.mxu0 %v3541_v0 }
 0x53f   :  { %2015 = vmatprep.subr.bf16.mxu0 %v3543_v46 }
 0x541   :  { %2117 = vmatmul.mubr.bf16.gmra.mxu1 %v3550_v4 }
 0x542   :  { %2016 = vmatpush1.bf16.msra.mxu0 %v3547_v60  ;;  %2126 = vmatprep.mubr.bf16.mxu1 %v5119_v7 }
 0x545   :  { %2034 = vmatmul.mubr.bf16.vlgmr.msra.gmra.mxu0 %v3549_v17 }
 0x546   :  { %2043 = vmatprep.mubr.bf16.mxu0 %v5119_v7 }
 0x549   :  { %2127 = vmatmul.mubr.bf16.gmra.mxu1 %v3551_v19 }
 0x54a   :  { %2136 = vmatprep.mubr.bf16.mxu1 %v5119_v7 }
 0x54d   :  { %2044 = vmatmul.mubr.bf16.gmra.mxu0 %v3550_v4 }
 0x54e   :  { %2053 = vmatprep.mubr.bf16.mxu0 %v5119_v7 }
 0x551   :  { %2137 = vmatmul.mubr.bf16.gmra.mxu1 %v3552_v51 }
 0x555   :  { %2054 = vmatmul.mubr.bf16.gmra.mxu0 %v3551_v19 }
 0x556   :  { %2063 = vmatprep.mubr.bf16.mxu0 %v5119_v7 }
 0x55d   :  { %2064 = vmatmul.mubr.bf16.gmra.mxu0 %v3552_v51 }
 0x5f9   :  { %v2108_v57 = vpop.f32.mrf.mxu1 }
 0x5fa   :  { %v2109_v1 = vadd.f32 %v2108_v57, %v4891_v48 }
 0x5fb   :  { %v2110_v11 = vpop.f32.mrf.mxu1 }
 0x5fc   :  { %2149 = vst [vmem:[#allocation3 + $0x10] sm:$0xff] %v2109_v1  ;;  %v2111_v55 = vadd.f32 %v2110_v11, %v4897_v50 }
 0x5fd   :  { %v2112_v3 = vpop.f32.mrf.mxu1 }
 0x5fe   :  { %2150 = vst [vmem:[#allocation3 + $0x18] sm:$0xff] %v2111_v55  ;;  %v2113_v61 = vadd.f32 %v2112_v3, %v4891_v48 }
 0x5ff   :  { %v2114_v53 = vpop.f32.mrf.mxu1 }
 0x600   :  { %2153 = vst [vmem:[#allocation3 + $0x30] sm:$0xff] %v2113_v61  ;;  %v2115_v9 = vadd.f32 %v2114_v53, %v4897_v50 }
 0x601   :  { %v2118_v45 = vpop.f32.mrf.mxu1 }
 0x602   :  { %2154 = vst [vmem:[#allocation3 + $0x38] sm:$0xff] %v2115_v9  ;;  %v2119_v46 = vadd.f32 %v2118_v45, %v4891_v48 }
 0x603   :  { %v2120_v14 = vpop.f32.mrf.mxu1 }
 0x604   :  { %2157 = vst [vmem:[#allocation3 + $0x50] sm:$0xff] %v2119_v46  ;;  %v2121_v17 = vadd.f32 %v2120_v14, %v4897_v50 }
 0x605   :  { %v2035_v56 = vpop.f32.mrf.mxu0  ;;  %v2122_v51 = vpop.f32.mrf.mxu1 }
 0x606   :  { %v2036_v7 = vadd.f32 %v2035_v56, %v4888_v8  ;;  %2158 = vst [vmem:[#allocation3 + $0x58] sm:$0xff] %v2121_v17  ;;  %v2123_v58 = vadd.f32 %v2122_v51, %v4891_v48 }
 0x607   :  { %v2037_v63 = vpop.f32.mrf.mxu0  ;;  %v2124_v57 = vpop.f32.mrf.mxu1 }
 0x608   :  { %2147 = vst [vmem:[#allocation3] sm:$0xff] %v2036_v7  ;;  %v2038_v54 = vadd.f32 %v2037_v63, %v4894_v49  ;;  %2161 = vst [vmem:[#allocation3 + $0x70] sm:$0xff] %v2123_v58  ;;  %v2125_v1 = vadd.f32 %v2124_v57, %v4897_v50 }
 0x609   :  { %v2039_v62 = vpop.f32.mrf.mxu0  ;;  %v2128_v11 = vpop.f32.mrf.mxu1 }
 0x60a   :  { %2148 = vst [vmem:[#allocation3 + $0x8] sm:$0xff] %v2038_v54  ;;  %v2040_v59 = vadd.f32 %v2039_v62, %v4888_v8  ;;  %2162 = vst [vmem:[#allocation3 + $0x78] sm:$0xff] %v2125_v1  ;;  %v2129_v55 = vadd.f32 %v2128_v11, %v4891_v48 }
 0x60b   :  { %v2041_v16 = vpop.f32.mrf.mxu0  ;;  %v2130_v3 = vpop.f32.mrf.mxu1 }
 0x60c   :  { %2151 = vst [vmem:[#allocation3 + $0x20] sm:$0xff] %v2040_v59  ;;  %v2042_v52 = vadd.f32 %v2041_v16, %v4894_v49  ;;  %2165 = vst [vmem:[#allocation3 + $0x90] sm:$0xff] %v2129_v55  ;;  %v2131_v61 = vadd.f32 %v2130_v3, %v4897_v50 }
 0x60d   :  { %v2045_v5 = vpop.f32.mrf.mxu0  ;;  %v2132_v53 = vpop.f32.mrf.mxu1 }
 0x60e   :  { %2152 = vst [vmem:[#allocation3 + $0x28] sm:$0xff] %v2042_v52  ;;  %v2046_v0 = vadd.f32 %v2045_v5, %v4888_v8  ;;  %2166 = vst [vmem:[#allocation3 + $0x98] sm:$0xff] %v2131_v61  ;;  %v2133_v9 = vadd.f32 %v2132_v53, %v4891_v48 }
 0x60f   :  { %v2047_v47 = vpop.f32.mrf.mxu0  ;;  %v2134_v45 = vpop.f32.mrf.mxu1 }
 0x610   :  { %2155 = vst [vmem:[#allocation3 + $0x40] sm:$0xff] %v2046_v0  ;;  %v2048_v60 = vadd.f32 %v2047_v47, %v4894_v49  ;;  %2169 = vst [vmem:[#allocation3 + $0xb0] sm:$0xff] %v2133_v9  ;;  %v2135_v46 = vadd.f32 %v2134_v45, %v4897_v50 }
 0x611   :  { %v2049_v4 = vpop.f32.mrf.mxu0  ;;  %v2138_v14 = vpop.f32.mrf.mxu1 }
 0x612   :  { %2156 = vst [vmem:[#allocation3 + $0x48] sm:$0xff] %v2048_v60  ;;  %v2050_v19 = vadd.f32 %v2049_v4, %v4888_v8  ;;  %2170 = vst [vmem:[#allocation3 + $0xb8] sm:$0xff] %v2135_v46  ;;  %v2139_v17 = vadd.f32 %v2138_v14, %v4891_v48 }
 0x613   :  { %v2051_v56 = vpop.f32.mrf.mxu0  ;;  %v2140_v51 = vpop.f32.mrf.mxu1 }
 0x614   :  { %2159 = vst [vmem:[#allocation3 + $0x60] sm:$0xff] %v2050_v19  ;;  %v2052_v7 = vadd.f32 %v2051_v56, %v4894_v49  ;;  %2173 = vst [vmem:[#allocation3 + $0xd0] sm:$0xff] %v2139_v17  ;;  %v2141_v58 = vadd.f32 %v2140_v51, %v4897_v50 }
 0x615   :  { %v2055_v63 = vpop.f32.mrf.mxu0  ;;  %v2142_v57 = vpop.f32.mrf.mxu1 }
 0x616   :  { %2160 = vst [vmem:[#allocation3 + $0x68] sm:$0xff] %v2052_v7  ;;  %v2056_v54 = vadd.f32 %v2055_v63, %v4888_v8  ;;  %2174 = vst [vmem:[#allocation3 + $0xd8] sm:$0xff] %v2141_v58  ;;  %v2143_v1 = vadd.f32 %v2142_v57, %v4891_v48 }
 0x617   :  { %v2057_v62 = vpop.f32.mrf.mxu0  ;;  %v2144_v11 = vpop.f32.mrf.mxu1 }
 0x618   :  { %2163 = vst [vmem:[#allocation3 + $0x80] sm:$0xff] %v2056_v54  ;;  %v2058_v59 = vadd.f32 %v2057_v62, %v4894_v49  ;;  %2177 = vst [vmem:[#allocation3 + $0xf0] sm:$0xff] %v2143_v1  ;;  %v2145_v55 = vadd.f32 %v2144_v11, %v4897_v50  ;;  %v4931_v62 = vmov 0.0  }
 0x619   :  { %v2059_v16 = vpop.f32.mrf.mxu0 }
 0x61a   :  { %2164 = vst [vmem:[#allocation3 + $0x88] sm:$0xff] %v2058_v59  ;;  %v2060_v52 = vadd.f32 %v2059_v16, %v4888_v8  ;;  %2178 = vst [vmem:[#allocation3 + $0xf8] sm:$0xff] %v2145_v55  ;;  %v4933_v59 = vmov 0.0  }
 0x61b   :  { %v2061_v5 = vpop.f32.mrf.mxu0 }
 0x61c   :  { %2167 = vst [vmem:[#allocation3 + $0xa0] sm:$0xff] %v2060_v52  ;;  %v2062_v0 = vadd.f32 %v2061_v5, %v4894_v49 }
 0x61d   :  { %v2065_v47 = vpop.f32.mrf.mxu0 }
 0x61e   :  { %2168 = vst [vmem:[#allocation3 + $0xa8] sm:$0xff] %v2062_v0  ;;  %v2066_v60 = vadd.f32 %v2065_v47, %v4888_v8 }
 0x61f   :  { %v2067_v4 = vpop.f32.mrf.mxu0 }
 0x620   :  { %2171 = vst [vmem:[#allocation3 + $0xc0] sm:$0xff] %v2066_v60  ;;  %v2068_v19 = vadd.f32 %v2067_v4, %v4894_v49 }
 0x621   :  { %v2069_v56 = vpop.f32.mrf.mxu0 }
 0x622   :  { %2172 = vst [vmem:[#allocation3 + $0xc8] sm:$0xff] %v2068_v19  ;;  %v2070_v7 = vadd.f32 %v2069_v56, %v4888_v8 }
 0x623   :  { %v2071_v63 = vpop.f32.mrf.mxu0 }
 0x624   :  { %2175 = vst [vmem:[#allocation3 + $0xe0] sm:$0xff] %v2070_v7  ;;  %v2072_v54 = vadd.f32 %v2071_v63, %v4894_v49 }
 0x626   :  { %2176 = vst [vmem:[#allocation3 + $0xe8] sm:$0xff] %v2072_v54 }
 0x627 LB: > { %v3096_v8 = vcombine.high %v4765_v41, %v4775_v43  ;;  %v3095_v48 = vcombine.low %v4765_v41, %v4775_v43  ;;  %v3092_v49 = vcombine.high %v4745_v37, %v4755_v39  ;;  %v3098_v50 = vcombine.high %v4770_v42, %v4780_v44  ;;  %s3114_s28 = sshll.u32 %s3649_s6, 5  ;;  %s3102_s30 = sshll.u32 %s3649_s6, 2  ;;  %s3649_s6 = sphi %s4935_s6, %s2184_s6   ;;  %v3645_v59 = vphi %v4933_v59, %v2464_v59   ;;  %v3641_v62 = vphi %v4931_v62, %v2462_v62  }
 0x628   : > { %v3097_v3 = vcombine.low %v4770_v42, %v4780_v44  ;;  %v3094_v61 = vcombine.high %v4750_v38, %v4760_v40  ;;  %v3091_v16 = vcombine.low %v4745_v37, %v4755_v39  ;;  %v3088_v52 = vcombine.high %v4725_v33, %v4735_v35  ;;  %s2189_s29 = scalar_lea.vmem [#allocation3], %s3114_s28  ;;  %s2467_s10 = scalar_lea.vmem [#allocation2], %s3102_s30 }
 0x629   : > { %2355 = vmatprep.subr.bf16.mxu0 %v3096_v8  ;;  %2396 = vmatprep.subr.bf16.mxu1 %v3098_v50  ;;  %v3093_v53 = vcombine.low %v4750_v38, %v4760_v40  ;;  %v3090_v9 = vcombine.high %v4730_v34, %v4740_v36  ;;  %v3654_v5 = vmov 0   ;;  %v3087_v0 = vcombine.low %v4725_v33, %v4735_v35  ;;  %s2184_s6 = sadd.s32 1, %s3649_s6  }
 0x62a   : > { %2356 = vmatpush1.bf16.msra.mxu0 %v3095_v48  ;;  %2397 = vmatpush1.bf16.msra.mxu1 %v3097_v3  ;;  %v3084_v45 = vcombine.high %v4705_v29, %v4715_v31  ;;  %v3089_v46 = vcombine.low %v4730_v34, %v4740_v36  ;;  %v3086_v47 = vcombine.high %v4710_v30, %v4720_v32  ;;  %p2181_p2 = scmp.ge.s32.totalorder %s2184_s6, 8  }
 0x62b   : > { %2357 = vmatprep.subr.bf16.mxu0 %v3092_v49  ;;  %2398 = vmatprep.subr.bf16.mxu1 %v3094_v61  ;;  %v3083_v60 = vcombine.low %v4705_v29, %v4715_v31  ;;  %v3080_v14 = vcombine.high %v4685_v25, %v4695_v27  ;;  %v3085_v17 = vcombine.low %v4710_v30, %v4720_v32 }
 0x62c   : > { %2387 = vmatprep.mubr.bf16.mxu0 %v3654_v5  ;;  %2428 = vmatprep.mubr.bf16.mxu1 %v3654_v5  ;;  %v3082_v4 = vcombine.high %v4690_v26, %v4700_v28  ;;  %v3079_v19 = vcombine.low %v4685_v25, %v4695_v27  ;;  %v3076_v51 = vcombine.high %v4665_v21, %v4675_v23  ;;  %v3578_v25 = vld [vmem:[%s5101_s7] sm:$0xff] (%p2181_p2)  }
 0x62d   : > { %v3081_v58 = vcombine.low %v4690_v26, %v4700_v28  ;;  %v3078_v56 = vcombine.high %v4670_v22, %v4680_v24  ;;  %v3075_v7 = vcombine.low %v4665_v21, %v4675_v23  ;;  %v3072_v57 = vcombine.high %v4645_v12, %v4655_v18  ;;  %v2190_v3 = vld [vmem:[%s2189_s29] sm:$0xff]  ;;  %v3576_v23 = vld [vmem:[%s5101_s7 + $0x10] sm:$0xff] (%p2181_p2)  }
 0x62e   : > { %2358 = vmatpush1.bf16.msra.mxu0 %v3091_v16  ;;  %2399 = vmatpush1.bf16.msra.mxu1 %v3093_v53  ;;  %v3077_v1 = vcombine.low %v4670_v22, %v4680_v24  ;;  %v3074_v63 = vcombine.high %v4650_v6, %v4660_v20  ;;  %v3071_v54 = vcombine.low %v4645_v12, %v4655_v18  ;;  %v2191_v16 = vld [vmem:[%s2189_s29 + $0x8] sm:$0xff]  ;;  %v2487_v12 = vld [vmem:[%s5099_s1 + $0x10] sm:$0xff] (%p2181_p2)  ;;  %v2492_v18 = vld [vmem:[%s5099_s1 + $0x38] sm:$0xff] (%p2181_p2) }
 0x62f   : > { %2359 = vmatprep.subr.bf16.mxu0 %v3088_v52  ;;  %2400 = vmatprep.subr.bf16.mxu1 %v3090_v9  ;;  %v3068_v11 = vcombine.high %v4623_v2, %v4633_v13  ;;  %v3073_v55 = vcombine.low %v4650_v6, %v4660_v20  ;;  %v3070_v8 = vcombine.high %v4628_v15, %v4640_v10  ;;  %v3573_v6 = vld [vmem:[%s5101_s7 + $0x28] sm:$0xff] (%p2181_p2)   ;;  %v2491_v20 = vld [vmem:[%s5099_s1 + $0x30] sm:$0xff] (%p2181_p2)  ;;  %v3574_v21 = vld [vmem:[%s5101_s7 + $0x20] sm:$0xff] (%p2181_p2)  }
 0x630   : > { %v3067_v48 = vcombine.low %v4623_v2, %v4633_v13  ;;  %v3069_v49 = vcombine.low %v4628_v15, %v4640_v10  ;;  %v2194_v50 = vpack.c.bf16 %v3645_v59, %v3645_v59  ;;  %v2486_v2 = vld [vmem:[%s5099_s1 + $0x8] sm:$0xff] (%p2181_p2)  ;;  %v3571_v15 = vld [vmem:[%s5101_s7 + $0x38] sm:$0xff] (%p2181_p2)   ;;  %v3572_v13 = vld [vmem:[%s5101_s7 + $0x30] sm:$0xff] (%p2181_p2)  }
 0x631   :  { %v2488_v10 = vld [vmem:[%s5099_s1 + $0x18] sm:$0xff] (%p2181_p2)  ;;  %v3577_v24 = vld [vmem:[%s5101_s7 + $0x8] sm:$0xff] (%p2181_p2)  }
 0x632   : > { %2360 = vmatpush1.bf16.msra.mxu0 %v3087_v0  ;;  %2401 = vmatpush1.bf16.msra.mxu1 %v3089_v46  ;;  %v3575_v22 = vld [vmem:[%s5101_s7 + $0x18] sm:$0xff] (%p2181_p2)  }
 0x633   : > { %2361 = vmatprep.subr.bf16.mxu0 %v3084_v45  ;;  %2402 = vmatprep.subr.bf16.mxu1 %v3086_v47 }
 0x636   : > { %2362 = vmatpush1.bf16.msra.mxu0 %v3083_v60  ;;  %2403 = vmatpush1.bf16.msra.mxu1 %v3085_v17  ;;  %v2193_v17 = vld [vmem:[%s2189_s29 + $0x18] sm:$0xff] }
 0x637   : > { %2363 = vmatprep.subr.bf16.mxu0 %v3080_v14  ;;  %2404 = vmatprep.subr.bf16.mxu1 %v3082_v4  ;;  %v2192_v4 = vld [vmem:[%s2189_s29 + $0x10] sm:$0xff] }
 0x63a   : > { %2364 = vmatpush1.bf16.msra.mxu0 %v3079_v19  ;;  %2405 = vmatpush1.bf16.msra.mxu1 %v3081_v58 }
 0x63b   : > { %2365 = vmatprep.subr.bf16.mxu0 %v3076_v51  ;;  %2406 = vmatprep.subr.bf16.mxu1 %v3078_v56 }
 0x63e   : > { %2366 = vmatpush1.bf16.msra.mxu0 %v3075_v7  ;;  %2407 = vmatpush1.bf16.msra.mxu1 %v3077_v1 }
 0x63f   : > { %2367 = vmatprep.subr.bf16.mxu0 %v3072_v57  ;;  %2408 = vmatprep.subr.bf16.mxu1 %v3074_v63 }
 0x642   : > { %2368 = vmatpush1.bf16.msra.mxu0 %v3071_v54  ;;  %2409 = vmatpush1.bf16.msra.mxu1 %v3073_v55 }
 0x643   : > { %2369 = vmatprep.subr.bf16.mxu0 %v3068_v11  ;;  %2410 = vmatprep.subr.bf16.mxu1 %v3070_v8 }
 0x646   : > { %2370 = vmatpush1.bf16.msra.mxu0 %v3067_v48  ;;  %2411 = vmatpush1.bf16.msra.mxu1 %v3069_v49 }
 0x647   :  { %3205 = vmatprep.subr.bf16.mxu0 (%p2181_p2), %v3571_v15  ;;  %3245 = vmatprep.subr.bf16.mxu1 (%p2181_p2), %v3571_v15 }
 0x649   : > { %2388 = vmatmul.mubr.bf16.vlgmr.msra.gmra.mxu0 %v2194_v50  ;;  %2429 = vmatmul.mubr.bf16.vlgmr.msra.gmra.mxu1 %v2194_v50 }
 0x64a   :  { %3206 = vmatpush3.bf16.msra.mxu0 (%p2181_p2), %v3571_v15  ;;  %3253 = vmatpush3.bf16.msra.mxu1 (%p2181_p2), %v3571_v15 }
 0x64b   :  { %3207 = vmatprep.subr.bf16.mxu0 (%p2181_p2), %v3572_v13  ;;  %3246 = vmatprep.subr.bf16.mxu1 (%p2181_p2), %v3572_v13 }
 0x64e   :  { %3208 = vmatpush3.bf16.msra.mxu0 (%p2181_p2), %v3572_v13  ;;  %3254 = vmatpush3.bf16.msra.mxu1 (%p2181_p2), %v3572_v13 }
 0x64f   :  { %3209 = vmatprep.subr.bf16.mxu0 (%p2181_p2), %v3573_v6  ;;  %3247 = vmatprep.subr.bf16.mxu1 (%p2181_p2), %v3573_v6 }
 0x652   :  { %3210 = vmatpush3.bf16.msra.mxu0 (%p2181_p2), %v3573_v6  ;;  %3255 = vmatpush3.bf16.msra.mxu1 (%p2181_p2), %v3573_v6 }
 0x653   :  { %3211 = vmatprep.subr.bf16.mxu0 (%p2181_p2), %v3574_v21  ;;  %3248 = vmatprep.subr.bf16.mxu1 (%p2181_p2), %v3574_v21 }
 0x656   :  { %3212 = vmatpush3.bf16.msra.mxu0 (%p2181_p2), %v3574_v21  ;;  %3256 = vmatpush3.bf16.msra.mxu1 (%p2181_p2), %v3574_v21 }
 0x657   :  { %3213 = vmatprep.subr.bf16.mxu0 (%p2181_p2), %v3575_v22  ;;  %3249 = vmatprep.subr.bf16.mxu1 (%p2181_p2), %v3575_v22 }
 0x65a   :  { %3214 = vmatpush3.bf16.msra.mxu0 (%p2181_p2), %v3575_v22  ;;  %3257 = vmatpush3.bf16.msra.mxu1 (%p2181_p2), %v3575_v22 }
 0x65b   :  { %3215 = vmatprep.subr.bf16.mxu0 (%p2181_p2), %v3576_v23  ;;  %3250 = vmatprep.subr.bf16.mxu1 (%p2181_p2), %v3576_v23 }
 0x65e   :  { %3216 = vmatpush3.bf16.msra.mxu0 (%p2181_p2), %v3576_v23  ;;  %3258 = vmatpush3.bf16.msra.mxu1 (%p2181_p2), %v3576_v23 }
 0x65f   :  { %3217 = vmatprep.subr.bf16.mxu0 (%p2181_p2), %v3577_v24  ;;  %3251 = vmatprep.subr.bf16.mxu1 (%p2181_p2), %v3577_v24 }
 0x662   :  { %3218 = vmatpush3.bf16.msra.mxu0 (%p2181_p2), %v3577_v24  ;;  %3259 = vmatpush3.bf16.msra.mxu1 (%p2181_p2), %v3577_v24 }
 0x663   :  { %3219 = vmatprep.subr.bf16.mxu0 (%p2181_p2), %v3578_v25  ;;  %3252 = vmatprep.subr.bf16.mxu1 (%p2181_p2), %v3578_v25 }
 0x666   :  { %3220 = vmatpush3.bf16.msra.mxu0 (%p2181_p2), %v3578_v25  ;;  %3260 = vmatpush3.bf16.msra.mxu1 (%p2181_p2), %v3578_v25 }
 0x709   : > { %v2389_v61 = vpop.f32.mrf.mxu0  ;;  %v2430_v53 = vpop.f32.mrf.mxu1 }
 0x70a   : > { %v2437_v52 = vadd.f32 %v2389_v61, %v2190_v3  ;;  %v2439_v51 = vadd.f32 %v2430_v53, %v2192_v4  ;;  %v2485_v53 = vld [vmem:[%s5099_s1] sm:$0xff] (%p2181_p2) }
 0x70b   : > { %v2391_v9 = vpop.f32.mrf.mxu0  ;;  %v2432_v45 = vpop.f32.mrf.mxu1 }
 0x70c   : > { %v3099_v5 = vmul.f32 -1.442695, %v2437_v52  ;;  %v2438_v0 = vadd.f32 %v2391_v9, %v2191_v16  ;;  %v2440_v19 = vadd.f32 %v2432_v45, %v2193_v17  ;;  %v5120_v16 = vmov (%p2181_p2), 0   ;;  %v2489_v52 = vld [vmem:[%s5099_s1 + $0x20] sm:$0xff] (%p2181_p2)  ;;  %v2490_v9 = vld [vmem:[%s5099_s1 + $0x28] sm:$0xff] (%p2181_p2) }
 0x70d   : > { %v2393_v46 = vpop.f32.mrf.mxu0  ;;  %v2434_v60 = vpop.f32.mrf.mxu1  ;;  %3570 = vset.pattern.permute.xlu1 (%p2181_p2), %v5120_v16  ;;  %3569 = vset.pattern.permute.xlu0 (%p2181_p2), %v5120_v16 }
 0x70e   : > { %3553 = vpow2.f32 %v3099_v5  ;;  %v3100_v47 = vmul.f32 -1.442695, %v2438_v0  ;;  %v3101_v58 = vmul.f32 -1.442695, %v2440_v19  ;;  %2515 = vperm.xlu1 (%p2181_p2), %3570, %v2489_v52   ;;  %2495 = vperm.xlu0 (%p2181_p2), %3569, %v2485_v53  }
 0x70f   : > { %v2394_v59 = vpop.f32.mrf.mxu0  ;;  %v2435_v14 = vpop.f32.mrf.mxu1 }
 0x710   : > { %3555 = vpow2.f32 %v3100_v47 }
 0x711   : > { %3557 = vtanh.f32 %v2439_v51 }
 0x712   : > { %3559 = vpow2.f32 %v3101_v58  ;;  %2520 = vperm.xlu1 (%p2181_p2), %3570, %v2490_v9   ;;  %2500 = vperm.xlu0 (%p2181_p2), %3569, %v2486_v2   ;;  %v3103_v58 = vld [vmem:[%s5102_s8] ss:$0 sm:$0xff] (%p2181_p2) }
 0x716   :  { %2510 = vperm.xlu1 (%p2181_p2), %3570, %v2488_v10   ;;  %2505 = vperm.xlu0 (%p2181_p2), %3569, %v2487_v12  }
 0x71a   :  { %2530 = vperm.xlu1 (%p2181_p2), %3570, %v2492_v18   ;;  %2525 = vperm.xlu0 (%p2181_p2), %3569, %v2491_v20  }
 0x71b   : > { %v3554_v56 = vpop.eup %3553 }
 0x71c   : > { %v2444_v7 = vadd.f32 1.0, %v3554_v56 }
 0x71d   : > { %v3556_v57 = vpop.eup %3555 }
 0x71e   : > { %3561 = vrcp.f32 %v2444_v7  ;;  %v2450_v1 = vadd.f32 1.0, %v3556_v57  ;;  %v3558_v63 = vpop.eup %3557 }
 0x71f   : > { %v3560_v54 = vpop.eup %3559 }
 0x720   : > { %3563 = vrcp.f32 %v2450_v1  ;;  %v2457_v8 = vadd.f32 1.0, %v3560_v54 }
 0x722   : > { %3565 = vrcp.f32 %v2457_v8 }
 0x72b   : > { %v3562_v11 = vpop.eup %3561 }
 0x72c   : > { %v2461_v49 = vmul.f32 %v3562_v11, %v3558_v63 }
 0x72d   : > { %v3564_v55 = vpop.eup %3563 }
 0x72e   : > { %v2460_v48 = vmul.f32 %v3641_v62, %v3564_v55 }
 0x72f   : > { %v3566_v50 = vpop.eup %3565 }
 0x730   : > { %v2462_v62 = vadd.f32 %v2461_v49, %v2460_v48  }
 0x732   : > { %3567 = vtanh.f32 %v2462_v62 }
 0x73f   : > { %v3568_v3 = vpop.eup %3567 }
 0x740   : > { %v2464_v59 = vmul.f32 %v3568_v3, %v3566_v50   ;;  %2183 = sbr.rel (!%p2181_p2) target bundleno = 1575 (0x627), region = 111 }
 0x742   : > { %v2465_v61 = vpack.c.bf16 %v2464_v59, %v2464_v59 }
 0x744   : > { %2468 = vst [vmem:[%s2467_s10] sm:$0xf] %v2465_v61 }
 0x74b   :  { %v3155_v26 = vld [vmem:[#allocation2 + $0x10] sm:$0xff]   ;;  %v3136_v27 = vld [vmem:[#allocation2] sm:$0xff]   ;;  %v3154_v34 = vld [vmem:[#allocation2 + $0x8] sm:$0xff]  }
 0x74c   :  { %v3145_v30 = vunpack.c.l.bf16 %v3155_v26  ;;  %v3137_v31 = vunpack.c.l.bf16 %v3136_v27  ;;  %v3146_v32 = vunpack.c.h.bf16 %v3155_v26  ;;  %v3138_v33 = vunpack.c.h.bf16 %v3136_v27  ;;  %v3156_v43 = vld [vmem:[#allocation2 + $0x18] sm:$0xff]  }
 0x74d   :  { %v3142_v37 = vunpack.c.h.bf16 %v3154_v34  ;;  %v3141_v38 = vunpack.c.l.bf16 %v3154_v34  ;;  %v3150_v47 = vunpack.c.h.bf16 %v3156_v43  ;;  %v3149_v60 = vunpack.c.l.bf16 %v3156_v43 }
 0x789   :  { %v2516_v28 = vpop.permute.xlu1 %2515  ;;  %v2496_v29 = vpop.permute.xlu0 %2495 }
 0x78a   :  { %v2537_v39 = vmul.f32 %v3145_v30, %v2516_v28  ;;  %v2533_v40 = vmul.f32 %v3137_v31, %v2496_v29 }
 0x78d   :  { %v2521_v35 = vpop.permute.xlu1 %2520  ;;  %v2501_v36 = vpop.permute.xlu0 %2500 }
 0x78e   :  { %v2538_v41 = vmul.f32 %v3146_v32, %v2521_v35  ;;  %v2534_v42 = vmul.f32 %v3138_v33, %v2501_v36 }
 0x790   :  { %v2541_v44 = vpack.c.bf16 %v2534_v42, %v2533_v40  ;;  %v2543_v62 = vpack.c.bf16 %v2538_v41, %v2537_v39 }
 0x791   :  { %v2511_v5 = vpop.permute.xlu1 %2510  ;;  %v2506_v0 = vpop.permute.xlu0 %2505 }
 0x792   :  { %v2536_v45 = vmul.f32 %v3142_v37, %v2511_v5  ;;  %v2535_v46 = vmul.f32 %v3141_v38, %v2506_v0  ;;  %3221 = vmatprep.mubr.bf16.mxu0 %v2541_v44  ;;  %3225 = vmatprep.mubr.bf16.mxu1 %v2543_v62 }
 0x794   :  { %v2542_v59 = vpack.c.bf16 %v2536_v45, %v2535_v46 }
 0x795   :  { %v2531_v14 = vpop.permute.xlu1 %2530  ;;  %v2526_v17 = vpop.permute.xlu0 %2525 }
 0x796   :  { %v2540_v4 = vmul.f32 %v3150_v47, %v2531_v14  ;;  %v2539_v19 = vmul.f32 %v3149_v60, %v2526_v17  ;;  %3222 = vmatmul.mubr.bf16.vlgmr.msra.gmra.mxu0 %v2542_v59 }
 0x798   :  { %v2544_v51 = vpack.c.bf16 %v2540_v4, %v2539_v19 }
 0x79a   :  { %3226 = vmatmul.mubr.bf16.vlgmr.msra.gmra.mxu1 %v2544_v51 }
 0x856   :  { %v3223_v56 = vpop.f32.mrf.mxu0 }
 0x857   :  { %v2659_v7 = vadd.f32 %v3223_v56, %v3103_v58 }
 0x858   :  { %v2650_v57 = vpop.f32.mrf.mxu0 }
 0x859   :  { %2683 = vst [vmem:[%s5103_s9 + $0x10] sm:$0xff] %v2659_v7  ;;  %v2651_v1 = vadd.f32 %v3103_v58, %v2650_v57 }
 0x85a   :  { %v3224_v63 = vpop.f32.mrf.mxu0  ;;  %v3227_v54 = vpop.f32.mrf.mxu1 }
 0x85b   :  { %2681 = vst [vmem:[%s5103_s9] sm:$0xff] %v2651_v1  ;;  %v2662_v11 = vadd.f32 %v3224_v63, %v3103_v58  ;;  %v2675_v55 = vadd.f32 %v3227_v54, %v3103_v58 }
 0x85c   :  { %v2653_v8 = vpop.f32.mrf.mxu0  ;;  %v2666_v48 = vpop.f32.mrf.mxu1 }
 0x85d   :  { %2684 = vst [vmem:[%s5103_s9 + $0x18] sm:$0xff] %v2662_v11  ;;  %2687 = vst [vmem:[%s5103_s9 + $0x30] sm:$0xff] %v2675_v55  ;;  %v2654_v49 = vadd.f32 %v3103_v58, %v2653_v8  ;;  %v2667_v50 = vadd.f32 %v3103_v58, %v2666_v48 }
 0x85e   :  { %v3228_v3 = vpop.f32.mrf.mxu1 }
 0x85f   :  { %2682 = vst [vmem:[%s5103_s9 + $0x8] sm:$0xff] %v2654_v49  ;;  %2685 = vst [vmem:[%s5103_s9 + $0x20] sm:$0xff] %v2667_v50  ;;  %v2678_v61 = vadd.f32 %v3228_v3, %v3103_v58 }
 0x860   :  { %v2669_v16 = vpop.f32.mrf.mxu1 }
 0x861   :  { %2688 = vst [vmem:[%s5103_s9 + $0x38] sm:$0xff] %v2678_v61  ;;  %v2670_v52 = vadd.f32 %v3103_v58, %v2669_v16 }
 0x863   :  { %2686 = vst [vmem:[%s5103_s9 + $0x28] sm:$0xff] %v2670_v52 }

</bundles_post_ra>
